<compile_context>
chip_gen: v6e
topology: v6e:2x2x1
jax: 0.10.0
libtpu: 0.0.40
codegen_flags: <defaults>
</compile_context>

<pallas_src>
import jax
import jax.numpy as jnp
from jax.experimental import pallas as pl
from jax.experimental.pallas import tpu as pltpu


def _se_kernel(x_ref, w1t_ref, b1_ref, w2t_ref, b2_ref, o_ref):
    # x_ref: (nb, C, HW)   w1t_ref: (C, Cr)  b1_ref: (1, Cr)
    # w2t_ref: (Cr, C)     b2_ref: (1, C)    o_ref: (nb, C, HW)
    nb, c, hw = x_ref.shape

    # --- Squeeze: global average pool over the lane (HW) axis, f32 accumulate.
    # Chunk the lane axis (multiples of 128) so sub-32-bit inputs never
    # materialize a full-block f32 upcast; f32 inputs take a single slab.
    if x_ref.dtype == jnp.float32:
        chunk = hw
    else:
        max_lanes = max(1, (4 * 1024 * 1024 // 4) // max(nb * c, 1))
        chunk = max(128, (max_lanes // 128) * 128)
    acc = jnp.zeros((nb, c), jnp.float32)
    start = 0
    while start < hw:                       # static (trace-time) loop
        size = min(chunk, hw - start)
        acc = acc + jnp.sum(
            x_ref[:, :, start:start + size].astype(jnp.float32), axis=-1)
        start += size
    pooled = acc * (1.0 / hw)                                        # (nb, C)

    # --- Excitation: FC1 -> ReLU -> FC2 -> sigmoid, f32 on the tiny vector.
    h = jnp.dot(pooled, w1t_ref[...], preferred_element_type=jnp.float32)
    h = jnp.maximum(h + b1_ref[...], 0.0)                            # (nb, Cr)
    z = jnp.dot(h, w2t_ref[...], preferred_element_type=jnp.float32)
    z = z + b2_ref[...]                                              # (nb, C)
    s = pl.reciprocal(1.0 + jnp.exp(-z))                             # sigmoid
    gate = s.astype(o_ref.dtype)

    # --- Scale: per-channel gate broadcast along the lane (HW) axis.
    o_ref[...] = x_ref[...] * gate[:, :, None]


def _default_vmem_limit():
    cap = None
    try:
        cap = getattr(pltpu.get_tpu_info(), "vmem_capacity_bytes", None)
    except Exception:
        cap = None
    if not cap:
        cap = 64 * 1024 * 1024          # assume the smallest chip (v7x) if query fails
    return int(cap) * 3 // 4            # ~96 MiB on v5e/v6e, ~48 MiB on v7x


def se_block(x_nchw, w1, b1, w2, b2, *, vmem_limit_bytes=None):
    """SE block forward. x_nchw: (N,C,H,W); w1:(Cr,C); b1:(Cr,); w2:(C,Cr); b2:(C,)."""
    N, C, H, W = x_nchw.shape
    Cr = w1.shape[0]
    HW = H * W
    dtype = x_nchw.dtype

    if vmem_limit_bytes is None:
        vmem_limit_bytes = _default_vmem_limit()

    # Zero-cost layout: NCHW -> (N, C, H*W); channels on sublanes, HW on lanes.
    x = x_nchw.reshape(N, C, HW)

    # Tiny weights: transpose / upcast to f32 once.
    w1t = jnp.transpose(w1).astype(jnp.float32)      # (C, Cr)
    w2t = jnp.transpose(w2).astype(jnp.float32)      # (Cr, C)
    b1r = b1.reshape(1, Cr).astype(jnp.float32)
    b2r = b2.reshape(1, C).astype(jnp.float32)

    # nb = images per grid step: largest count whose double-buffered in + out
    # blocks fit the VMEM budget after weights / internal-scratch / pool-temp
    # headroom.  Decoupled from N's divisors via a cdiv grid (ragged last
    # block handled by Pallas padded-read / dropped-write semantics).
    itemsize = jnp.dtype(dtype).itemsize
    weight_bytes = 2 * 4 * (C * Cr + Cr * C + C + Cr)     # double-buffered f32 weights
    reserve = 6 * 1024 * 1024                             # Mosaic scratch + pool chunk temp
    usable = max(0, int(vmem_limit_bytes) - weight_bytes - reserve)
    per_image = 4 * C * HW * itemsize                     # 2x input + 2x output blocks
    nb = max(1, min(N, usable // max(per_image, 1)))
    # TODO(synk): if a single (1, C, HW) image block ever exceeds the VMEM
    # budget, add an HW-split grid axis ('arbitrary') with a pooled f32
    # accumulator + pl.when finalize instead of relying on nb=1 fitting.
    grid = (pl.cdiv(N, nb),)

    out = pl.pallas_call(
        _se_kernel,
        out_shape=jax.ShapeDtypeStruct((N, C, HW), dtype),
        grid_spec=pltpu.PrefetchScalarGridSpec(
            num_scalar_prefetch=0,
            grid=grid,
            in_specs=[
                pl.BlockSpec((nb, C, HW), lambda b: (b, 0, 0)),
                pl.BlockSpec((C, Cr), lambda b: (0, 0)),
                pl.BlockSpec((1, Cr), lambda b: (0, 0)),
                pl.BlockSpec((Cr, C), lambda b: (0, 0)),
                pl.BlockSpec((1, C), lambda b: (0, 0)),
            ],
            out_specs=pl.BlockSpec((nb, C, HW), lambda b: (b, 0, 0)),
        ),
        compiler_params=pltpu.CompilerParams(
            dimension_semantics=("parallel",),
            vmem_limit_bytes=int(vmem_limit_bytes),
        ),
    )(x, w1t, b1r, w2t, b2r)

    return out.reshape(N, C, H, W)


def se_block_ref(x, w1, b1, w2, b2):
    """Pure-JAX reference mirroring the PyTorch module."""
    pooled = jnp.mean(x.astype(jnp.float32), axis=(2, 3))            # (N, C)
    h = jnp.maximum(pooled @ w1.T + b1, 0.0)                         # (N, Cr)
    s = jax.nn.sigmoid(h @ w2.T + b2)                                # (N, C)
    return s.astype(x.dtype)[:, :, None, None] * x


if __name__ == "__main__":
    # SE-typical small shapes: C=128 (one full 128-lane vreg worth of
    # channels), r=16 -> Cr=8, H=W=16 -> HW=256 keeps stores lane-dense.
    N, C, H, W = 4, 128, 16, 16
    r = 16
    Cr = C // r

    key = jax.random.PRNGKey(0)
    kx, k1, k2, k3, k4 = jax.random.split(key, 5)

    x = jax.random.normal(kx, (N, C, H, W), dtype=jnp.float32)

    # nn.Linear-style init: uniform in +-1/sqrt(fan_in).
    lim1 = 1.0 / (C ** 0.5)
    w1 = jax.random.uniform(k1, (Cr, C), jnp.float32, -lim1, lim1)
    b1 = jax.random.uniform(k2, (Cr,), jnp.float32, -lim1, lim1)
    lim2 = 1.0 / (Cr ** 0.5)
    w2 = jax.random.uniform(k3, (C, Cr), jnp.float32, -lim2, lim2)
    b2 = jax.random.uniform(k4, (C,), jnp.float32, -lim2, lim2)

    out = jax.block_until_ready(se_block(x, w1, b1, w2, b2))
    ref = se_block_ref(x, w1, b1, w2, b2)

    assert out.shape == (N, C, H, W)
    assert out.dtype == x.dtype
    assert jnp.allclose(out, ref, atol=1e-5, rtol=1e-5)

    print("KERNEL_OK")
</pallas_src>

<mosaic_0001>
module attributes {stable_mosaic.version = 11 : i64} {
  func.func @_se_kernel(%arg0: i32, %arg1: memref<4x128x256xf32, #tpu.memory_space<vmem>>, %arg2: memref<128x8xf32, #tpu.memory_space<vmem>>, %arg3: memref<1x8xf32, #tpu.memory_space<vmem>>, %arg4: memref<8x128xf32, #tpu.memory_space<vmem>>, %arg5: memref<1x128xf32, #tpu.memory_space<vmem>>, %arg6: memref<4x128x256xf32, #tpu.memory_space<vmem>>) attributes {dimension_semantics = [#tpu.dimension_semantics<parallel>], iteration_bounds = array<i64: 1>, scalar_prefetch = 0 : i64, scratch_operands = 0 : i64, tpu.core_type = #tpu.core_type<tc>, window_params = [{transform_indices = @transform_0, window_bounds = array<i64: 4, 128, 256>}, {pipeline_mode = #tpu.pipeline_mode<synchronous>, transform_indices = @transform_1, window_bounds = array<i64: 128, 8>}, {pipeline_mode = #tpu.pipeline_mode<synchronous>, transform_indices = @transform_2, window_bounds = array<i64: 1, 8>}, {pipeline_mode = #tpu.pipeline_mode<synchronous>, transform_indices = @transform_3, window_bounds = array<i64: 8, 128>}, {pipeline_mode = #tpu.pipeline_mode<synchronous>, transform_indices = @transform_4, window_bounds = array<i64: 1, 128>}, {transform_indices = @transform_5, window_bounds = array<i64: 4, 128, 256>}]} {
    %cst = arith.constant 0.000000e+00 : f32
    %0 = vector.broadcast %cst : f32 to vector<4x128xf32>
    %c0 = arith.constant 0 : index
    %c0_0 = arith.constant 0 : index
    %c0_1 = arith.constant 0 : index
    %1 = vector.load %arg1[%c0, %c0_0, %c0_1] : memref<4x128x256xf32, #tpu.memory_space<vmem>>, vector<4x128x256xf32>
    %cst_2 = arith.constant dense<0.000000e+00> : vector<4x128xf32>
    %2 = vector.multi_reduction <add>, %1, %cst_2 [2] : vector<4x128x256xf32> to vector<4x128xf32>
    %3 = arith.addf %0, %2 : vector<4x128xf32>
    %cst_3 = arith.constant 3.906250e-03 : f32
    %4 = vector.broadcast %cst_3 : f32 to vector<4x128xf32>
    %5 = arith.mulf %3, %4 : vector<4x128xf32>
    %c0_4 = arith.constant 0 : index
    %c0_5 = arith.constant 0 : index
    %6 = vector.load %arg2[%c0_4, %c0_5] : memref<128x8xf32, #tpu.memory_space<vmem>>, vector<128x8xf32>
    %cst_6 = arith.constant dense<0.000000e+00> : vector<4x8xf32>
    %7 = tpu.matmul %5, %6, %cst_6 {dimension_numbers = #tpu.dot_dimension_numbers<[1], [0], [0], [1], [0, 0, 1, 1], [], []>} : vector<4x128xf32>, vector<128x8xf32>, vector<4x8xf32> -> vector<4x8xf32>
    %c0_7 = arith.constant 0 : index
    %c0_8 = arith.constant 0 : index
    %8 = vector.load %arg3[%c0_7, %c0_8] : memref<1x8xf32, #tpu.memory_space<vmem>>, vector<1x8xf32>
    %9 = vector.broadcast %8 : vector<1x8xf32> to vector<4x8xf32>
    %10 = arith.addf %7, %9 : vector<4x8xf32>
    %cst_9 = arith.constant 0.000000e+00 : f32
    %11 = vector.broadcast %cst_9 : f32 to vector<4x8xf32>
    %12 = arith.maximumf %10, %11 : vector<4x8xf32>
    %c0_10 = arith.constant 0 : index
    %c0_11 = arith.constant 0 : index
    %13 = vector.load %arg4[%c0_10, %c0_11] : memref<8x128xf32, #tpu.memory_space<vmem>>, vector<8x128xf32>
    %cst_12 = arith.constant dense<0.000000e+00> : vector<4x128xf32>
    %14 = tpu.matmul %12, %13, %cst_12 {dimension_numbers = #tpu.dot_dimension_numbers<[1], [0], [0], [1], [0, 0, 1, 1], [], []>} : vector<4x8xf32>, vector<8x128xf32>, vector<4x128xf32> -> vector<4x128xf32>
    %c0_13 = arith.constant 0 : index
    %c0_14 = arith.constant 0 : index
    %15 = vector.load %arg5[%c0_13, %c0_14] : memref<1x128xf32, #tpu.memory_space<vmem>>, vector<1x128xf32>
    %16 = vector.broadcast %15 : vector<1x128xf32> to vector<4x128xf32>
    %17 = arith.addf %14, %16 : vector<4x128xf32>
    %cst_15 = arith.constant 0.000000e+00 : f32
    %18 = vector.broadcast %cst_15 : f32 to vector<4x128xf32>
    %19 = arith.subf %18, %17 : vector<4x128xf32>
    %20 = math.exp %19 : vector<4x128xf32>
    %cst_16 = arith.constant 1.000000e+00 : f32
    %21 = vector.broadcast %cst_16 : f32 to vector<4x128xf32>
    %22 = arith.addf %21, %20 : vector<4x128xf32>
    %23 = tpu.reciprocal %22 : vector<4x128xf32> -> vector<4x128xf32>
    %c0_17 = arith.constant 0 : index
    %c0_18 = arith.constant 0 : index
    %c0_19 = arith.constant 0 : index
    %24 = vector.load %arg1[%c0_17, %c0_18, %c0_19] : memref<4x128x256xf32, #tpu.memory_space<vmem>>, vector<4x128x256xf32>
    %25 = vector.shape_cast %23 : vector<4x128xf32> to vector<4x128x1xf32>
    %26 = vector.broadcast %25 : vector<4x128x1xf32> to vector<4x128x256xf32>
    %27 = arith.mulf %24, %26 : vector<4x128x256xf32>
    %c0_20 = arith.constant 0 : index
    %c0_21 = arith.constant 0 : index
    %c0_22 = arith.constant 0 : index
    %28 = vector.load %arg6[%c0_20, %c0_21, %c0_22] : memref<4x128x256xf32, #tpu.memory_space<vmem>>, vector<4x128x256xf32>
    tpu.vector_store %arg6[%c0_20, %c0_21, %c0_22], %27 {strides = array<i32>} : memref<4x128x256xf32, #tpu.memory_space<vmem>>, vector<4x128x256xf32>,
    return
  }
  func.func @transform_0(%arg0: i32) -> (i32, i32, i32) {
    %c0_i32 = arith.constant 0 : i32
    %c0_i32_0 = arith.constant 0 : i32
    %c0_i32_1 = arith.constant 0 : i32
    return %arg0, %c0_i32, %c0_i32_0 : i32, i32, i32
  }
  func.func @transform_1(%arg0: i32) -> (i32, i32) {
    %c0_i32 = arith.constant 0 : i32
    %c0_i32_0 = arith.constant 0 : i32
    %c0_i32_1 = arith.constant 0 : i32
    return %c0_i32, %c0_i32_0 : i32, i32
  }
  func.func @transform_2(%arg0: i32) -> (i32, i32) {
    %c0_i32 = arith.constant 0 : i32
    %c0_i32_0 = arith.constant 0 : i32
    %c0_i32_1 = arith.constant 0 : i32
    return %c0_i32, %c0_i32_0 : i32, i32
  }
  func.func @transform_3(%arg0: i32) -> (i32, i32) {
    %c0_i32 = arith.constant 0 : i32
    %c0_i32_0 = arith.constant 0 : i32
    %c0_i32_1 = arith.constant 0 : i32
    return %c0_i32, %c0_i32_0 : i32, i32
  }
  func.func @transform_4(%arg0: i32) -> (i32, i32) {
    %c0_i32 = arith.constant 0 : i32
    %c0_i32_0 = arith.constant 0 : i32
    %c0_i32_1 = arith.constant 0 : i32
    return %c0_i32, %c0_i32_0 : i32, i32
  }
  func.func @transform_5(%arg0: i32) -> (i32, i32, i32) {
    %c0_i32 = arith.constant 0 : i32
    %c0_i32_0 = arith.constant 0 : i32
    %c0_i32_1 = arith.constant 0 : i32
    return %arg0, %c0_i32, %c0_i32_0 : i32, i32, i32
  }
}

</mosaic_0001>

<bundles_post_ra>
// kernel: tpu_custom_call.1
= control target key start
LH: loop header
LB: loop body
LE: loop exit
PB: predicated region body
PF: predicated region fallthrough
CT: control target
= control target key end

     0   :  { %10 = vsyncpa [#allocation3], 0  ;;  %s2352_s0 = inlined_call_operand.hbm [shape: f32[4,128,256], index: 0, kind: input, shape index: {}]   ;;  %s2353_s1 = inlined_call_operand.vmem [shape: f32[128,8], index: 1, kind: input, shape index: {}]   ;;  %s2354_s2 = inlined_call_operand.vmem [shape: f32[1,8], index: 2, kind: input, shape index: {}]   ;;  %s2355_s3 = inlined_call_operand.vmem [shape: f32[8,128], index: 3, kind: input, shape index: {}]   ;;  %s2356_s4 = inlined_call_operand.vmem [shape: f32[1,128], index: 4, kind: input, shape index: {}]   ;;  %s2357_s5 = inlined_call_operand.hbm [shape: f32[4,128,256], index: 5, kind: output, shape index: {}]  }
   0x1   :  { %11 = vsyncpa [#allocation4], 0  ;;  %s1868_s18 = smov [#allocation2]  }
   0x2   :  { %s17_s19 = sshll.u32 %s1868_s18, 4  ;;  %s18_s19 = int_to_ptr.vmem [resolvable:$true] %s17_s19 }
   0x3   :  { %s1832_s20 = scalar_lea.vmem %s18_s19, 16384  ;;  %p1837_p1 = scmp.lt.s32.totalorder %s18_s19, %s18_s19 }
   0x4   :  { %p1833_p0 = scmp.ne.s32.totalorder %s18_s19, %s1832_s20  ;;  %p1838_p2 = scmp.lt.s32.totalorder %s1832_s20, %s1832_s20 }
   0x6   :  { %p1839_p3 = por %p1838_p2, %p1837_p1 }
   0x8   :  { %p1840_p4 = pnand %p1839_p3, %p1833_p0 }
   0xa   :  { %1843 = shalt.err (!%p1840_p4)
}
   0xb   :  { %s1869_s21 = smov 256   ;;  %s1870_s22 = smov 16  }
   0xc   :  { %23 = dma.hbm_to_vmem [thread:$0]  %s2352_s0, 16384, %s18_s19, [#allocation3], %s1869_s21, %s1869_s21, %s1870_s22  }
   0xd   :  { %1864 = dma.done.wait [#allocation3], 16384  }
   0xe   :  { %1865 = vsyncadd [#allocation3], 4294950912  ;;  %v67_v0 = vld [vmem:[#allocation2 + $0x100] sm:$0xff]  ;;  %v68_v1 = vld [vmem:[#allocation2 + $0x108] sm:$0xff]  ;;  %vm1872_vm0 = vmmov 0   ;;  %vm581_vm1 = vcmask 130112  }
   0xf   :  { %v35_v2 = vld [vmem:[#allocation2] sm:$0xff]  ;;  %v211_v3 = vadd.f32 %v68_v1, %v67_v0  ;;  %v36_v4 = vld [vmem:[#allocation2 + $0x8] sm:$0xff]  ;;  %v69_v5 = vld [vmem:[#allocation2 + $0x110] sm:$0xff]  ;;  %vm588_vm2 = vcmask 195712   ;;  %vm595_vm3 = vcmask 261312   ;;  %vm602_vm4 = vcmask 326912  }
  0x10   :  { %v70_v6 = vld [vmem:[#allocation2 + $0x118] sm:$0xff]  ;;  %v163_v7 = vadd.f32 %v36_v4, %v35_v2  ;;  %v37_v8 = vld [vmem:[#allocation2 + $0x10] sm:$0xff]  ;;  %v71_v12 = vld [vmem:[#allocation2 + $0x120] sm:$0xff]  ;;  %vm609_vm5 = vcmask 392512   ;;  %vm616_vm6 = vcmask 458112   ;;  %vm623_vm7 = vcmask 523712  }
  0x11   :  { %v38_v9 = vld [vmem:[#allocation2 + $0x18] sm:$0xff]  ;;  %212 = vadd.xlane.f32.xlu1 %v211_v3  ;;  %v214_v10 = vadd.f32 %v70_v6, %v69_v5  ;;  %v72_v13 = vld [vmem:[#allocation2 + $0x128] sm:$0xff]  ;;  %v39_v14 = vld [vmem:[#allocation2 + $0x20] sm:$0xff]  ;;  %vm630_vm8 = vcmask 589312   ;;  %vm637_vm9 = vcmask 654912   ;;  %vm644_vm10 = vcmask 720512  }
  0x12   :  { %164 = vadd.xlane.f32.xlu0 %v163_v7  ;;  %v166_v11 = vadd.f32 %v38_v9, %v37_v8  ;;  %v40_v15 = vld [vmem:[#allocation2 + $0x28] sm:$0xff]  ;;  %v217_v16 = vadd.f32 %v72_v13, %v71_v12  ;;  %v101_v18 = vld [vmem:[#allocation2 + $0x210] sm:$0xff]  ;;  %v102_v19 = vld [vmem:[#allocation2 + $0x218] sm:$0xff]  ;;  %vm651_vm11 = vcmask 786112   ;;  %vm658_vm12 = vcmask 851712  }
  0x13   :  { %v169_v17 = vadd.f32 %v40_v15, %v39_v14  ;;  %v99_v20 = vld [vmem:[#allocation2 + $0x200] sm:$0xff]  ;;  %v100_v21 = vld [vmem:[#allocation2 + $0x208] sm:$0xff]  ;;  %v262_v22 = vadd.f32 %v102_v19, %v101_v18  ;;  %v73_v24 = vld [vmem:[#allocation2 + $0x130] sm:$0xff]  ;;  %vm665_vm13 = vcmask 917312   ;;  %vm672_vm14 = vcmask 982912  }
  0x14   :  { %v259_v23 = vadd.f32 %v100_v21, %v99_v20  ;;  %v74_v25 = vld [vmem:[#allocation2 + $0x138] sm:$0xff]  ;;  %v41_v26 = vld [vmem:[#allocation2 + $0x30] sm:$0xff]  ;;  %v131_v30 = vld [vmem:[#allocation2 + $0x300] sm:$0xff]  ;;  %vm679_vm15 = vcmask 1048512  }
  0x15   :  { %215 = vadd.xlane.f32.xlu1 %v214_v10  ;;  %v42_v27 = vld [vmem:[#allocation2 + $0x38] sm:$0xff]  ;;  %v220_v28 = vadd.f32 %v74_v25, %v73_v24  ;;  %v132_v31 = vld [vmem:[#allocation2 + $0x308] sm:$0xff]  ;;  %v103_v32 = vld [vmem:[#allocation2 + $0x220] sm:$0xff] }
  0x16   :  { %167 = vadd.xlane.f32.xlu0 %v166_v11  ;;  %v172_v29 = vadd.f32 %v42_v27, %v41_v26  ;;  %v104_v33 = vld [vmem:[#allocation2 + $0x228] sm:$0xff]  ;;  %v307_v34 = vadd.f32 %v132_v31, %v131_v30  ;;  %v43_v36 = vld [vmem:[#allocation2 + $0x40] sm:$0xff]  ;;  %v133_v38 = vld [vmem:[#allocation2 + $0x310] sm:$0xff] }
  0x17   :  { %v265_v35 = vadd.f32 %v104_v33, %v103_v32  ;;  %v44_v37 = vld [vmem:[#allocation2 + $0x48] sm:$0xff]  ;;  %v134_v39 = vld [vmem:[#allocation2 + $0x318] sm:$0xff]  ;;  %v105_v42 = vld [vmem:[#allocation2 + $0x230] sm:$0xff] }
  0x18   :  { %v175_v40 = vadd.f32 %v44_v37, %v43_v36  ;;  %v310_v41 = vadd.f32 %v134_v39, %v133_v38  ;;  %v106_v43 = vld [vmem:[#allocation2 + $0x238] sm:$0xff]  ;;  %v75_v44 = vld [vmem:[#allocation2 + $0x140] sm:$0xff]  ;;  %v76_v45 = vld [vmem:[#allocation2 + $0x148] sm:$0xff] }
  0x19   :  { %218 = vadd.xlane.f32.xlu1 %v217_v16  ;;  %v268_v46 = vadd.f32 %v106_v43, %v105_v42  ;;  %v223_v47 = vadd.f32 %v76_v45, %v75_v44  ;;  %v45_v48 = vld [vmem:[#allocation2 + $0x50] sm:$0xff]  ;;  %v46_v49 = vld [vmem:[#allocation2 + $0x58] sm:$0xff]  ;;  %v135_v50 = vld [vmem:[#allocation2 + $0x320] sm:$0xff] }
  0x1a   :  { %170 = vadd.xlane.f32.xlu0 %v169_v17  ;;  %v136_v51 = vld [vmem:[#allocation2 + $0x328] sm:$0xff]  ;;  %v178_v52 = vadd.f32 %v46_v49, %v45_v48  ;;  %v107_v54 = vld [vmem:[#allocation2 + $0x240] sm:$0xff]  ;;  %v77_v56 = vld [vmem:[#allocation2 + $0x150] sm:$0xff] }
  0x1b   :  { %v313_v53 = vadd.f32 %v136_v51, %v135_v50  ;;  %v108_v55 = vld [vmem:[#allocation2 + $0x248] sm:$0xff]  ;;  %v78_v57 = vld [vmem:[#allocation2 + $0x158] sm:$0xff]  ;;  %v47_v60 = vld [vmem:[#allocation2 + $0x60] sm:$0xff] }
  0x1c   :  { %v271_v58 = vadd.f32 %v108_v55, %v107_v54  ;;  %v226_v59 = vadd.f32 %v78_v57, %v77_v56  ;;  %v48_v61 = vld [vmem:[#allocation2 + $0x68] sm:$0xff]  ;;  %v137_v62 = vld [vmem:[#allocation2 + $0x330] sm:$0xff]  ;;  %v138_v63 = vld [vmem:[#allocation2 + $0x338] sm:$0xff] }
  0x1d   :  { %263 = vadd.xlane.f32.xlu1 %v262_v22  ;;  %v181_v0 = vadd.f32 %v48_v61, %v47_v60  ;;  %v316_v1 = vadd.f32 %v138_v63, %v137_v62  ;;  %v109_v2 = vld [vmem:[#allocation2 + $0x250] sm:$0xff]  ;;  %v110_v3 = vld [vmem:[#allocation2 + $0x258] sm:$0xff]  ;;  %v79_v4 = vld [vmem:[#allocation2 + $0x160] sm:$0xff] }
  0x1e   :  { %260 = vadd.xlane.f32.xlu0 %v259_v23  ;;  %v80_v5 = vld [vmem:[#allocation2 + $0x168] sm:$0xff]  ;;  %v274_v6 = vadd.f32 %v110_v3, %v109_v2  ;;  %v49_v8 = vld [vmem:[#allocation2 + $0x70] sm:$0xff]  ;;  %v50_v9 = vld [vmem:[#allocation2 + $0x78] sm:$0xff] }
  0x1f   :  { %v229_v7 = vadd.f32 %v80_v5, %v79_v4  ;;  %v139_v10 = vld [vmem:[#allocation2 + $0x340] sm:$0xff]  ;;  %v140_v11 = vld [vmem:[#allocation2 + $0x348] sm:$0xff]  ;;  %v184_v12 = vadd.f32 %v50_v9, %v49_v8  ;;  %v81_v16 = vld [vmem:[#allocation2 + $0x170] sm:$0xff] }
  0x20   :  { %v319_v13 = vadd.f32 %v140_v11, %v139_v10  ;;  %v111_v14 = vld [vmem:[#allocation2 + $0x260] sm:$0xff]  ;;  %v112_v15 = vld [vmem:[#allocation2 + $0x268] sm:$0xff]  ;;  %v82_v17 = vld [vmem:[#allocation2 + $0x178] sm:$0xff] }
  0x21   :  { %221 = vadd.xlane.f32.xlu1 %v220_v28  ;;  %v277_v18 = vadd.f32 %v112_v15, %v111_v14  ;;  %v232_v19 = vadd.f32 %v82_v17, %v81_v16  ;;  %v51_v20 = vld [vmem:[#allocation2 + $0x80] sm:$0xff]  ;;  %v52_v21 = vld [vmem:[#allocation2 + $0x88] sm:$0xff]  ;;  %v141_v22 = vld [vmem:[#allocation2 + $0x350] sm:$0xff] }
  0x22   :  { %173 = vadd.xlane.f32.xlu0 %v172_v29  ;;  %v142_v23 = vld [vmem:[#allocation2 + $0x358] sm:$0xff]  ;;  %v187_v24 = vadd.f32 %v52_v21, %v51_v20  ;;  %v113_v26 = vld [vmem:[#allocation2 + $0x270] sm:$0xff]  ;;  %v83_v28 = vld [vmem:[#allocation2 + $0x180] sm:$0xff] }
  0x23   :  { %v322_v25 = vadd.f32 %v142_v23, %v141_v22  ;;  %v114_v27 = vld [vmem:[#allocation2 + $0x278] sm:$0xff]  ;;  %v84_v29 = vld [vmem:[#allocation2 + $0x188] sm:$0xff]  ;;  %v53_v32 = vld [vmem:[#allocation2 + $0x90] sm:$0xff] }
  0x24   :  { %v280_v30 = vadd.f32 %v114_v27, %v113_v26  ;;  %v235_v31 = vadd.f32 %v84_v29, %v83_v28  ;;  %v54_v33 = vld [vmem:[#allocation2 + $0x98] sm:$0xff]  ;;  %v115_v38 = vld [vmem:[#allocation2 + $0x280] sm:$0xff]  ;;  %v116_v39 = vld [vmem:[#allocation2 + $0x288] sm:$0xff] }
  0x25   :  { %308 = vadd.xlane.f32.xlu1 %v307_v34  ;;  %v143_v34 = vld [vmem:[#allocation2 + $0x360] sm:$0xff]  ;;  %v190_v36 = vadd.f32 %v54_v33, %v53_v32  ;;  %v283_v42 = vadd.f32 %v116_v39, %v115_v38  ;;  %v56_v45 = vld [vmem:[#allocation2 + $0xa8] sm:$0xff]  ;;  %v117_v50 = vld [vmem:[#allocation2 + $0x290] sm:$0xff] }
  0x26   :  { %266 = vadd.xlane.f32.xlu0 %v265_v35  ;;  %v144_v35 = vld [vmem:[#allocation2 + $0x368] sm:$0xff]  ;;  %v55_v44 = vld [vmem:[#allocation2 + $0xa0] sm:$0xff]  ;;  %v118_v51 = vld [vmem:[#allocation2 + $0x298] sm:$0xff] }
  0x27   :  { %v325_v37 = vadd.f32 %v144_v35, %v143_v34  ;;  %v193_v48 = vadd.f32 %v56_v45, %v55_v44  ;;  %v286_v54 = vadd.f32 %v118_v51, %v117_v50  ;;  %v57_v56 = vld [vmem:[#allocation2 + $0xb0] sm:$0xff]  ;;  %v58_v57 = vld [vmem:[#allocation2 + $0xb8] sm:$0xff]  ;;  %v119_v62 = vld [vmem:[#allocation2 + $0x2a0] sm:$0xff]  ;;  %v1871_v50 = vmov 0.0  }
  0x28   :  { %v196_v60 = vadd.f32 %v58_v57, %v57_v56  ;;  %v120_v63 = vld [vmem:[#allocation2 + $0x2a8] sm:$0xff]  ;;  %v59_v4 = vld [vmem:[#allocation2 + $0xc0] sm:$0xff]  ;;  %v121_v10 = vld [vmem:[#allocation2 + $0x2b0] sm:$0xff]  ;;  %1646 = vmatprep.subr.mxu0 %v1871_v50  ;;  %1681 = vmatprep.subr.mxu1 %v1871_v50 }
  0x29   :  { %176 = vadd.xlane.f32.xlu1 %v175_v40  ;;  %v85_v40 = vld [vmem:[#allocation2 + $0x190] sm:$0xff]  ;;  %v289_v2 = vadd.f32 %v120_v63, %v119_v62  ;;  %v60_v5 = vld [vmem:[#allocation2 + $0xc8] sm:$0xff]  ;;  %v122_v11 = vld [vmem:[#allocation2 + $0x2b8] sm:$0xff]  ;;  %1678 = vmatprep.mubr.msk.f32.mxu0 %vm1872_vm0, %v1871_v50 }
  0x2a   :  { %311 = vadd.xlane.f32.xlu0 %v310_v41  ;;  %v86_v41 = vld [vmem:[#allocation2 + $0x198] sm:$0xff]  ;;  %v199_v8 = vadd.f32 %v60_v5, %v59_v4  ;;  %v292_v14 = vadd.f32 %v122_v11, %v121_v10  ;;  %v61_v16 = vld [vmem:[#allocation2 + $0xd0] sm:$0xff]  ;;  %v123_v22 = vld [vmem:[#allocation2 + $0x2c0] sm:$0xff]  ;;  %1683 = vmatprep.mubr.msk.f32.mxu1 %vm1872_vm0, %v1871_v50  ;;  %vm918_vm0 = vcmask 1041409  }
  0x2b   :  { %v238_v43 = vadd.f32 %v86_v41, %v85_v40  ;;  %v62_v17 = vld [vmem:[#allocation2 + $0xd8] sm:$0xff]  ;;  %v124_v23 = vld [vmem:[#allocation2 + $0x2c8] sm:$0xff]  ;;  %v63_v28 = vld [vmem:[#allocation2 + $0xe0] sm:$0xff] }
  0x2c   :  { %v202_v20 = vadd.f32 %v62_v17, %v61_v16  ;;  %v295_v26 = vadd.f32 %v124_v23, %v123_v22  ;;  %v64_v29 = vld [vmem:[#allocation2 + $0xe8] sm:$0xff]  ;;  %v125_v34 = vld [vmem:[#allocation2 + $0x2d0] sm:$0xff]  ;;  %v126_v35 = vld [vmem:[#allocation2 + $0x2d8] sm:$0xff] }
  0x2d   :  { %269 = vadd.xlane.f32.xlu1 %v268_v46  ;;  %v145_v46 = vld [vmem:[#allocation2 + $0x370] sm:$0xff]  ;;  %v205_v32 = vadd.f32 %v64_v29, %v63_v28  ;;  %v298_v38 = vadd.f32 %v126_v35, %v125_v34  ;;  %v66_v41 = vld [vmem:[#allocation2 + $0xf8] sm:$0xff]  ;;  %v488_v11 = vld [vmem:[%s2353_s1 + $0x28] sm:$0xff] }
  0x2e   :  { %224 = vadd.xlane.f32.xlu0 %v223_v47  ;;  %v146_v47 = vld [vmem:[#allocation2 + $0x378] sm:$0xff]  ;;  %v65_v40 = vld [vmem:[#allocation2 + $0xf0] sm:$0xff]  ;;  %v484_v16 = vld [vmem:[%s2353_s1 + $0x8] sm:$0xff] }
  0x2f   :  { %v328_v49 = vadd.f32 %v146_v47, %v145_v46  ;;  %v208_v44 = vadd.f32 %v66_v41, %v65_v40  ;;  %v127_v46 = vld [vmem:[#allocation2 + $0x2e0] sm:$0xff]  ;;  %v128_v47 = vld [vmem:[#allocation2 + $0x2e8] sm:$0xff]  ;;  %v498_v51 = vld [vmem:[%s2353_s1 + $0x78] sm:$0xff] }
  0x30   :  { %1647 = vmatpush3.msra.mxu0 %v498_v51  ;;  %v130_v56 = vld [vmem:[#allocation2 + $0x2f8] sm:$0xff]  ;;  %v157_v57 = vld [vmem:[#allocation2 + $0x3d0] sm:$0xff]  ;;  %v570_v51 = vlaneseq }
  0x31   :  { %179 = vadd.xlane.f32.xlu1 %v178_v52  ;;  %v87_v52 = vld [vmem:[#allocation2 + $0x1a0] sm:$0xff]  ;;  %1648 = vmatprep.subr.mxu0 %v1871_v50  ;;  %v161_v63 = vld [vmem:[#allocation2 + $0x3f0] sm:$0xff] }
  0x32   :  { %314 = vadd.xlane.f32.xlu0 %v313_v53  ;;  %v88_v53 = vld [vmem:[#allocation2 + $0x1a8] sm:$0xff]  ;;  %v493_v5 = vld [vmem:[%s2353_s1 + $0x50] sm:$0xff] }
  0x33   :  { %v241_v55 = vadd.f32 %v88_v53, %v87_v52  ;;  %v301_v52 = vadd.f32 %v128_v47, %v127_v46  ;;  %v497_v53 = vld [vmem:[%s2353_s1 + $0x70] sm:$0xff] }
  0x34   :  { %1649 = vmatpush3.msra.mxu0 %v497_v53  ;;  %v489_v10 = vld [vmem:[%s2353_s1 + $0x30] sm:$0xff] }
  0x35   :  { %272 = vadd.xlane.f32.xlu1 %v271_v58  ;;  %v147_v58 = vld [vmem:[#allocation2 + $0x380] sm:$0xff]  ;;  %1650 = vmatprep.subr.mxu0 %v1871_v50 }
  0x36   :  { %227 = vadd.xlane.f32.xlu0 %v226_v59  ;;  %v148_v59 = vld [vmem:[#allocation2 + $0x388] sm:$0xff] }
  0x37   :  { %v331_v61 = vadd.f32 %v148_v59, %v147_v58  ;;  %v158_v58 = vld [vmem:[#allocation2 + $0x3d8] sm:$0xff]  ;;  %v496_v59 = vld [vmem:[%s2353_s1 + $0x68] sm:$0xff] }
  0x38   :  { %1651 = vmatpush3.msra.mxu0 %v496_v59  ;;  %v346_v62 = vadd.f32 %v158_v58, %v157_v57 }
  0x39   :  { %182 = vadd.xlane.f32.xlu1 %v181_v0  ;;  %v89_v0 = vld [vmem:[#allocation2 + $0x1b0] sm:$0xff]  ;;  %1652 = vmatprep.subr.mxu0 %v1871_v50 }
  0x3a   :  { %317 = vadd.xlane.f32.xlu0 %v316_v1  ;;  %v90_v1 = vld [vmem:[#allocation2 + $0x1b8] sm:$0xff] }
  0x3b   :  { %v244_v3 = vadd.f32 %v90_v1, %v89_v0  ;;  %v162_v0 = vld [vmem:[#allocation2 + $0x3f8] sm:$0xff]  ;;  %v159_v1 = vld [vmem:[#allocation2 + $0x3e0] sm:$0xff] }
  0x3c   :  { %v352_v4 = vadd.f32 %v162_v0, %v161_v63 }
  0x3d   :  { %275 = vadd.xlane.f32.xlu1 %v274_v6  ;;  %v149_v6 = vld [vmem:[#allocation2 + $0x390] sm:$0xff] }
  0x3e   :  { %230 = vadd.xlane.f32.xlu0 %v229_v7  ;;  %v150_v7 = vld [vmem:[#allocation2 + $0x398] sm:$0xff] }
  0x3f   :  { %v334_v9 = vadd.f32 %v150_v7, %v149_v6  ;;  %v492_v7 = vld [vmem:[%s2353_s1 + $0x48] sm:$0xff] }
  0x41   :  { %185 = vadd.xlane.f32.xlu1 %v184_v12  ;;  %v91_v12 = vld [vmem:[#allocation2 + $0x1c0] sm:$0xff] }
  0x42   :  { %320 = vadd.xlane.f32.xlu0 %v319_v13  ;;  %v92_v13 = vld [vmem:[#allocation2 + $0x1c8] sm:$0xff] }
  0x43   :  { %v247_v15 = vadd.f32 %v92_v13, %v91_v12  ;;  %v487_v12 = vld [vmem:[%s2353_s1 + $0x20] sm:$0xff]  ;;  %v486_v13 = vld [vmem:[%s2353_s1 + $0x18] sm:$0xff] }
  0x45   :  { %278 = vadd.xlane.f32.xlu1 %v277_v18  ;;  %v151_v18 = vld [vmem:[#allocation2 + $0x3a0] sm:$0xff] }
  0x46   :  { %233 = vadd.xlane.f32.xlu0 %v232_v19  ;;  %v152_v19 = vld [vmem:[#allocation2 + $0x3a8] sm:$0xff] }
  0x47   :  { %v337_v21 = vadd.f32 %v152_v19, %v151_v18  ;;  %v483_v18 = vld [vmem:[%s2353_s1] sm:$0xff] }
  0x49   :  { %188 = vadd.xlane.f32.xlu1 %v187_v24  ;;  %v93_v24 = vld [vmem:[#allocation2 + $0x1d0] sm:$0xff] }
  0x4a   :  { %323 = vadd.xlane.f32.xlu0 %v322_v25  ;;  %v94_v25 = vld [vmem:[#allocation2 + $0x1d8] sm:$0xff] }
  0x4b   :  { %v250_v27 = vadd.f32 %v94_v25, %v93_v24 }
  0x4d   :  { %281 = vadd.xlane.f32.xlu1 %v280_v30  ;;  %v153_v30 = vld [vmem:[#allocation2 + $0x3b0] sm:$0xff] }
  0x4e   :  { %236 = vadd.xlane.f32.xlu0 %v235_v31  ;;  %v154_v31 = vld [vmem:[#allocation2 + $0x3b8] sm:$0xff] }
  0x4f   :  { %v340_v33 = vadd.f32 %v154_v31, %v153_v30 }
  0x51   :  { %191 = vadd.xlane.f32.xlu1 %v190_v36  ;;  %v95_v36 = vld [vmem:[#allocation2 + $0x1e0] sm:$0xff] }
  0x52   :  { %326 = vadd.xlane.f32.xlu0 %v325_v37  ;;  %v96_v37 = vld [vmem:[#allocation2 + $0x1e8] sm:$0xff] }
  0x53   :  { %v253_v39 = vadd.f32 %v96_v37, %v95_v36 }
  0x55   :  { %284 = vadd.xlane.f32.xlu1 %v283_v42  ;;  %v155_v42 = vld [vmem:[#allocation2 + $0x3c0] sm:$0xff] }
  0x56   :  { %239 = vadd.xlane.f32.xlu0 %v238_v43  ;;  %v156_v43 = vld [vmem:[#allocation2 + $0x3c8] sm:$0xff] }
  0x57   :  { %v343_v45 = vadd.f32 %v156_v43, %v155_v42 }
  0x59   :  { %194 = vadd.xlane.f32.xlu1 %v193_v48  ;;  %v97_v48 = vld [vmem:[#allocation2 + $0x1f0] sm:$0xff] }
  0x5a   :  { %329 = vadd.xlane.f32.xlu0 %v328_v49  ;;  %v98_v49 = vld [vmem:[#allocation2 + $0x1f8] sm:$0xff] }
  0x5d   :  { %287 = vadd.xlane.f32.xlu1 %v286_v54  ;;  %v256_v54 = vadd.f32 %v98_v49, %v97_v48 }
  0x5e   :  { %242 = vadd.xlane.f32.xlu0 %v241_v55  ;;  %v129_v55 = vld [vmem:[#allocation2 + $0x2f0] sm:$0xff] }
  0x61   :  { %197 = vadd.xlane.f32.xlu1 %v196_v60  ;;  %v304_v60 = vadd.f32 %v130_v56, %v129_v55  ;;  %v2051_v56 = vshrl.u32 %v570_v51, 7 }
  0x62   :  { %332 = vadd.xlane.f32.xlu0 %v331_v61  ;;  %v495_v61 = vld [vmem:[%s2353_s1 + $0x60] sm:$0xff] }
  0x63   :  { %1653 = vmatpush3.msra.mxu0 %v495_v61 }
  0x64   :  { %1654 = vmatprep.subr.mxu0 %v1871_v50 }
  0x65   :  { %290 = vadd.xlane.f32.xlu1 %v289_v2  ;;  %v160_v2 = vld [vmem:[#allocation2 + $0x3e8] sm:$0xff] }
  0x66   :  { %245 = vadd.xlane.f32.xlu0 %v244_v3  ;;  %v494_v3 = vld [vmem:[%s2353_s1 + $0x58] sm:$0xff]  ;;  %v349_v6 = vadd.f32 %v160_v2, %v159_v1 }
  0x67   :  { %1655 = vmatpush3.msra.mxu0 %v494_v3 }
  0x68   :  { %1656 = vmatprep.subr.mxu0 %v1871_v50 }
  0x69   :  { %200 = vadd.xlane.f32.xlu1 %v199_v8  ;;  %1657 = vmatpush3.msra.mxu0 %v493_v5  ;;  %v491_v8 = vld [vmem:[%s2353_s1 + $0x40] sm:$0xff] }
  0x6a   :  { %335 = vadd.xlane.f32.xlu0 %v334_v9  ;;  %1658 = vmatprep.subr.mxu0 %v1871_v50  ;;  %v490_v9 = vld [vmem:[%s2353_s1 + $0x38] sm:$0xff] }
  0x6b   :  { %1659 = vmatpush3.msra.mxu0 %v492_v7 }
  0x6c   :  { %1660 = vmatprep.subr.mxu0 %v1871_v50 }
  0x6d   :  { %293 = vadd.xlane.f32.xlu1 %v292_v14  ;;  %1661 = vmatpush3.msra.mxu0 %v491_v8  ;;  %v485_v14 = vld [vmem:[%s2353_s1 + $0x10] sm:$0xff] }
  0x6e   :  { %248 = vadd.xlane.f32.xlu0 %v247_v15  ;;  %1662 = vmatprep.subr.mxu0 %v1871_v50 }
  0x6f   :  { %1663 = vmatpush3.msra.mxu0 %v490_v9 }
  0x70   :  { %1664 = vmatprep.subr.mxu0 %v1871_v50 }
  0x71   :  { %203 = vadd.xlane.f32.xlu1 %v202_v20  ;;  %1665 = vmatpush3.msra.mxu0 %v489_v10 }
  0x72   :  { %338 = vadd.xlane.f32.xlu0 %v337_v21  ;;  %1666 = vmatprep.subr.mxu0 %v1871_v50 }
  0x73   :  { %1667 = vmatpush3.msra.mxu0 %v488_v11 }
  0x74   :  { %1668 = vmatprep.subr.mxu0 %v1871_v50 }
  0x75   :  { %296 = vadd.xlane.f32.xlu1 %v295_v26  ;;  %1669 = vmatpush3.msra.mxu0 %v487_v12 }
  0x76   :  { %251 = vadd.xlane.f32.xlu0 %v250_v27  ;;  %1670 = vmatprep.subr.mxu0 %v1871_v50 }
  0x77   :  { %1671 = vmatpush3.msra.mxu0 %v486_v13 }
  0x78   :  { %1672 = vmatprep.subr.mxu0 %v1871_v50 }
  0x79   :  { %206 = vadd.xlane.f32.xlu1 %v205_v32  ;;  %1673 = vmatpush3.msra.mxu0 %v485_v14 }
  0x7a   :  { %341 = vadd.xlane.f32.xlu0 %v340_v33  ;;  %1674 = vmatprep.subr.mxu0 %v1871_v50 }
  0x7b   :  { %1675 = vmatpush3.msra.mxu0 %v484_v16 }
  0x7c   :  { %1676 = vmatprep.subr.mxu0 %v1871_v50 }
  0x7d   :  { %299 = vadd.xlane.f32.xlu1 %v298_v38  ;;  %1677 = vmatpush3.msra.mxu0 %v483_v18 }
  0x7e   :  { %254 = vadd.xlane.f32.xlu0 %v253_v39 }
  0x81   :  { %209 = vadd.xlane.f32.xlu1 %v208_v44 }
  0x82   :  { %344 = vadd.xlane.f32.xlu0 %v343_v45 }
  0x85   :  { %302 = vadd.xlane.f32.xlu1 %v301_v52 }
  0x86   :  { %257 = vadd.xlane.f32.xlu0 %v256_v54  ;;  %v571_v54 = vand.u32 127, %v570_v51 }
  0x88   :  { %v576_v58 = vadd.s32 4294967288, %v571_v54  ;;  %v583_v59 = vadd.s32 4294967280, %v571_v54  ;;  %v597_v61 = vadd.s32 4294967264, %v571_v54  ;;  %v611_v63 = vadd.s32 4294967248, %v571_v54 }
  0x89   :  { %305 = vadd.xlane.f32.xlu1 %v304_v60  ;;  %v590_v60 = vadd.s32 4294967272, %v571_v54  ;;  %v618_v0 = vadd.s32 4294967240, %v571_v54  ;;  %v625_v1 = vadd.s32 4294967232, %v571_v54  ;;  %v2058_v3 = vsub.s32 %v571_v54, %v2051_v56 }
  0x8a   :  { %347 = vadd.xlane.f32.xlu0 %v346_v62  ;;  %v604_v62 = vadd.s32 4294967256, %v571_v54  ;;  %v639_v5 = vadd.s32 4294967216, %v571_v54  ;;  %v646_v7 = vadd.s32 4294967208, %v571_v54  ;;  %v2063_v8 = vsub.s32 %v576_v58, %v2051_v56 }
  0x8b   :  { %v2066_v9 = vsub.s32 %v583_v59, %v2051_v56  ;;  %v653_v10 = vadd.s32 4294967200, %v571_v54  ;;  %v2069_v11 = vsub.s32 %v590_v60, %v2051_v56  ;;  %v2072_v12 = vsub.s32 %v597_v61, %v2051_v56 }
  0x8c   :  { %v2075_v13 = vsub.s32 %v604_v62, %v2051_v56  ;;  %v2078_v14 = vsub.s32 %v611_v63, %v2051_v56  ;;  %v2081_v16 = vsub.s32 %v618_v0, %v2051_v56  ;;  %v2084_v18 = vsub.s32 %v625_v1, %v2051_v56 }
  0x8d   :  { %353 = vadd.xlane.f32.xlu1 %v352_v4  ;;  %v632_v4 = vadd.s32 4294967224, %v571_v54  ;;  %v660_v58 = vadd.s32 4294967192, %v571_v54  ;;  %v667_v59 = vadd.s32 4294967184, %v571_v54  ;;  %v2093_v62 = vsub.s32 %v639_v5, %v2051_v56 }
  0x8e   :  { %350 = vadd.xlane.f32.xlu0 %v349_v6  ;;  %v2096_v63 = vsub.s32 %v646_v7, %v2051_v56 }
  0x8f   :  { %v2090_v61 = vsub.s32 %v632_v4, %v2051_v56  ;;  %2365 = vst [vmem:[#allocation10_spill] sm:$0xff] %v2093_v62 }
  0x90   :  { %2366 = vst [vmem:[#allocation11_spill] sm:$0xff] %v2096_v63 }
  0x9a   :  { %v1967_v15 = vpop.xlane.xlu1 %212 }
  0x9b   :  { %v1972_v17 = vpop.xlane.xlu0 %164  ;;  %v435_v1 = vmul.f32 0.00390625, %v1967_v15 }
  0x9c   :  { %v419_v63 = vmul.f32 0.00390625, %v1972_v17 }
  0x9d   :  { %v684_v17 = vrot.slane %v435_v1, %v2058_v3 }
  0x9e   :  { %v1981_v19 = vpop.xlane.xlu1 %215 }
  0x9f   :  { %v1983_v20 = vpop.xlane.xlu0 %167  ;;  %v436_v60 = vmul.f32 0.00390625, %v1981_v19  ;;  %v2104_v19 = vsub.s32 %v653_v10, %v2051_v56 }
  0xa1   :  { %2368 = vst [vmem:[#allocation13_spill] sm:$0xff] %v2104_v19 }
  0xa2   :  { %v1985_v21 = vpop.xlane.xlu1 %218 }
  0xa3   :  { %v1987_v22 = vpop.xlane.xlu0 %170 }
  0xa4   :  { %v421_v4 = vmul.f32 0.00390625, %v1987_v22  ;;  %v688_v22 = vrot.slane %v436_v60, %v2063_v8 }
  0xa6   :  { %v1989_v23 = vpop.xlane.xlu1 %263 }
  0xa7   :  { %v1991_v24 = vpop.xlane.xlu0 %260  ;;  %v452_v5 = vmul.f32 0.00390625, %v1989_v23 }
  0xa8   :  { %v451_v62 = vmul.f32 0.00390625, %v1991_v24 }
  0xaa   :  { %v1993_v25 = vpop.xlane.xlu1 %221  ;;  %v763_v60 = vrot.slane %v451_v62, %v2058_v3 }
  0xab   :  { %v1995_v26 = vpop.xlane.xlu0 %173  ;;  %v438_v7 = vmul.f32 0.00390625, %v1993_v25  ;;  %v674_v25 = vadd.s32 4294967176, %v571_v54 }
  0xac   :  { %v422_v15 = vmul.f32 0.00390625, %v1995_v26 }
  0xae   :  { %v1997_v27 = vpop.xlane.xlu1 %308  ;;  %v594_v54 = vrot.slane %v422_v15, %v2069_v11 }
  0xaf   :  { %v1999_v28 = vpop.xlane.xlu0 %266  ;;  %v467_v1 = vmul.f32 0.00390625, %v1997_v27 }
  0xb0   :  { %v453_v23 = vmul.f32 0.00390625, %v1999_v28  ;;  %v698_v28 = vrot.slane %v438_v7, %v2069_v11 }
  0xb2   :  { %v2001_v29 = vpop.xlane.xlu1 %176 }
  0xb3   :  { %v2003_v30 = vpop.xlane.xlu0 %311  ;;  %v423_v24 = vmul.f32 0.00390625, %v2001_v29  ;;  %v575_v29 = vrot.slane %v419_v63, %v2058_v3 }
  0xb6   :  { %v2005_v31 = vpop.xlane.xlu1 %269 }
  0xb7   :  { %v2007_v32 = vpop.xlane.xlu0 %224 }
  0xb8   :  { %v439_v62 = vmul.f32 0.00390625, %v2007_v32 }
  0xba   :  { %v2009_v33 = vpop.xlane.xlu1 %179 }
  0xbb   :  { %v2011_v34 = vpop.xlane.xlu0 %314 }
  0xbe   :  { %v2013_v35 = vpop.xlane.xlu1 %272 }
  0xbf   :  { %v2015_v36 = vpop.xlane.xlu0 %227 }
  0xc2   :  { %v2017_v37 = vpop.xlane.xlu1 %182 }
  0xc3   :  { %v2019_v38 = vpop.xlane.xlu0 %317 }
  0xc6   :  { %v2021_v39 = vpop.xlane.xlu1 %275 }
  0xc7   :  { %v2023_v40 = vpop.xlane.xlu0 %230 }
  0xca   :  { %v2025_v41 = vpop.xlane.xlu1 %185 }
  0xcb   :  { %v2027_v42 = vpop.xlane.xlu0 %320 }
  0xce   :  { %v2029_v43 = vpop.xlane.xlu1 %278 }
  0xcf   :  { %v2031_v44 = vpop.xlane.xlu0 %233 }
  0xd2   :  { %v2033_v45 = vpop.xlane.xlu1 %188 }
  0xd3   :  { %v2035_v46 = vpop.xlane.xlu0 %323 }
  0xd6   :  { %v2037_v47 = vpop.xlane.xlu1 %281 }
  0xd7   :  { %v2039_v48 = vpop.xlane.xlu0 %236 }
  0xda   :  { %v2041_v49 = vpop.xlane.xlu1 %191 }
  0xdb   :  { %v2043_v50 = vpop.xlane.xlu0 %326 }
  0xde   :  { %v2045_v52 = vpop.xlane.xlu1 %284 }
  0xdf   :  { %v2047_v53 = vpop.xlane.xlu0 %239 }
  0xe2   :  { %v2049_v55 = vpop.xlane.xlu1 %194 }
  0xe3   :  { %v2053_v57 = vpop.xlane.xlu0 %329 }
  0xe6   :  { %v2055_v2 = vpop.xlane.xlu1 %287 }
  0xe7   :  { %v2060_v6 = vpop.xlane.xlu0 %242 }
  0xe8   :  { %2363 = vst [vmem:[#allocation8_spill] sm:$0xff] %v2060_v6  ;;  %v420_v6 = vmul.f32 0.00390625, %v1983_v20  ;;  %v2115_v20 = vsub.s32 %v660_v58, %v2051_v56  ;;  %v468_v58 = vmul.f32 0.00390625, %v2003_v30  ;;  %v689_v30 = vsel %vm581_vm1, %v688_v22, %v684_v17 }
  0xe9   :  { %v842_v17 = vrot.slane %v467_v1, %v2058_v3  ;;  %v440_v3 = vmul.f32 0.00390625, %v2015_v36  ;;  %v426_v1 = vmul.f32 0.00390625, %v2025_v41  ;;  %v457_v36 = vmul.f32 0.00390625, %v2029_v43 }
  0xea   :  { %v2086_v51 = vpop.xlane.xlu1 %197  ;;  %2369 = vst [vmem:[#allocation14_spill] sm:$0xff] %v2115_v20  ;;  %v580_v26 = vrot.slane %v420_v6, %v2063_v8  ;;  %v454_v6 = vmul.f32 0.00390625, %v2005_v31  ;;  %v846_v27 = vrot.slane %v468_v58, %v2063_v8  ;;  %v2149_v31 = vsub.s32 %v674_v25, %v2051_v56 }
  0xeb   :  { %2364 = vst [vmem:[#allocation9_spill] sm:$0xff] %v2086_v51  ;;  %v2098_v0 = vpop.xlane.xlu0 %332  ;;  %v437_v51 = vmul.f32 0.00390625, %v1985_v21  ;;  %v2118_v21 = vsub.s32 %v667_v59, %v2051_v56  ;;  %v587_v59 = vrot.slane %v421_v4, %v2066_v9  ;;  %v772_v4 = vrot.slane %v453_v23, %v2066_v9 }
  0xec   :  { %2367 = vst [vmem:[#allocation12_spill] sm:$0xff] %v2098_v0  ;;  %v582_v63 = vsel %vm581_vm1, %v580_v26, %v575_v29  ;;  %v703_v58 = vrot.slane %v439_v62, %v2072_v12  ;;  %v456_v29 = vmul.f32 0.00390625, %v2021_v39  ;;  %v442_v39 = vmul.f32 0.00390625, %v2031_v44 }
  0xed   :  { %2370 = vst [vmem:[#allocation15_spill] sm:$0xff] %v2118_v21  ;;  %v693_v19 = vrot.slane %v437_v51, %v2066_v9  ;;  %v767_v21 = vrot.slane %v452_v5, %v2063_v8  ;;  %v601_v5 = vrot.slane %v423_v24, %v2072_v12  ;;  %v589_v20 = vsel %vm588_vm2, %v587_v59, %v582_v63 }
  0xee   :  { %v2112_v0 = vpop.xlane.xlu1 %290  ;;  %v424_v24 = vmul.f32 0.00390625, %v2009_v33  ;;  %v596_v32 = vsel %vm595_vm3, %v594_v54, %v589_v20  ;;  %v469_v8 = vmul.f32 0.00390625, %v2011_v34  ;;  %v455_v33 = vmul.f32 0.00390625, %v2013_v35 }
  0xef   :  { %v2123_v10 = vpop.xlane.xlu0 %245  ;;  %v694_v15 = vsel %vm588_vm2, %v693_v19, %v689_v30  ;;  %v768_v22 = vsel %vm581_vm1, %v767_v21, %v763_v60  ;;  %v777_v19 = vrot.slane %v454_v6, %v2069_v11  ;;  %v603_v21 = vsel %vm602_vm4, %v601_v5, %v596_v32 }
  0xf0   :  { %v699_v23 = vsel %vm595_vm3, %v698_v28, %v694_v15  ;;  %v773_v26 = vsel %vm588_vm2, %v772_v4, %v768_v22  ;;  %v847_v20 = vsel %vm581_vm1, %v846_v27, %v842_v17  ;;  %v425_v60 = vmul.f32 0.00390625, %v2017_v37 }
  0xf1   :  { %v470_v34 = vmul.f32 0.00390625, %v2019_v38  ;;  %v608_v28 = vrot.slane %v424_v24, %v2075_v13  ;;  %v441_v54 = vmul.f32 0.00390625, %v2023_v40  ;;  %v778_v35 = vsel %vm595_vm3, %v777_v19, %v773_v26 }
  0xf2   :  { %v2137_v51 = vpop.xlane.xlu1 %200  ;;  %v851_v6 = vrot.slane %v469_v8, %v2066_v9  ;;  %v471_v30 = vmul.f32 0.00390625, %v2027_v42  ;;  %v704_v38 = vsel %vm602_vm4, %v703_v58, %v699_v23  ;;  %v782_v4 = vrot.slane %v455_v33, %v2072_v12 }
  0xf3   :  { %v2143_v7 = vpop.xlane.xlu0 %335  ;;  %v427_v40 = vmul.f32 0.00390625, %v2033_v45  ;;  %v708_v41 = vrot.slane %v440_v3, %v2075_v13  ;;  %v615_v9 = vrot.slane %v425_v60, %v2078_v14  ;;  %v856_v42 = vrot.slane %v470_v34, %v2069_v11 }
  0xf4   :  { %v472_v43 = vmul.f32 0.00390625, %v2035_v46  ;;  %v610_v62 = vsel %vm609_vm5, %v608_v28, %v603_v21  ;;  %v787_v63 = vrot.slane %v456_v29, %v2075_v13  ;;  %v713_v15 = vrot.slane %v441_v54, %v2078_v14 }
  0xf5   :  { %v622_v44 = vrot.slane %v426_v1, %v2081_v16  ;;  %v852_v45 = vsel %vm588_vm2, %v851_v6, %v847_v20  ;;  %v861_v27 = vrot.slane %v471_v30, %v2072_v12  ;;  %v792_v22 = vrot.slane %v457_v36, %v2078_v14 }
  0xf6   :  { %v2159_v25 = vpop.xlane.xlu1 %293  ;;  %v458_v23 = vmul.f32 0.00390625, %v2037_v47  ;;  %v783_v46 = vsel %vm602_vm4, %v782_v4, %v778_v35  ;;  %v718_v24 = vrot.slane %v442_v39, %v2081_v16  ;;  %v629_v32 = vrot.slane %v427_v40, %v2084_v18  ;;  %v2371_v4 = vld [vmem:[#allocation8_spill] sm:$0xff]  ;;  %v2372_v40 = vld [vmem:[#allocation9_spill] sm:$0xff] }
  0xf7   :  { %v2165_v59 = vpop.xlane.xlu0 %248  ;;  %v443_v17 = vmul.f32 0.00390625, %v2039_v48  ;;  %v709_v8 = vsel %vm609_vm5, %v708_v41, %v704_v38  ;;  %v617_v12 = vsel %vm616_vm6, %v615_v9, %v610_v62  ;;  %v857_v26 = vsel %vm595_vm3, %v856_v42, %v852_v45  ;;  %v2373_v42 = vld [vmem:[#allocation12_spill] sm:$0xff]  ;;  %v2374_v45 = vld [vmem:[#allocation10_spill] sm:$0xff] }
  0xf8   :  { %v866_v47 = vrot.slane %v472_v43, %v2075_v13  ;;  %v788_v21 = vsel %vm609_vm5, %v787_v63, %v783_v46  ;;  %v714_v58 = vsel %vm616_vm6, %v713_v15, %v709_v8  ;;  %v624_v33 = vsel %vm623_vm7, %v622_v44, %v617_v12 }
  0xf9   :  { %v428_v20 = vmul.f32 0.00390625, %v2041_v49  ;;  %v862_v48 = vsel %vm602_vm4, %v861_v27, %v857_v26  ;;  %v793_v3 = vsel %vm616_vm6, %v792_v22, %v788_v21  ;;  %v797_v60 = vrot.slane %v458_v23, %v2081_v16  ;;  %v2376_v26 = vld [vmem:[#allocation13_spill] sm:$0xff] }
  0xfa   :  { %v2179_v37 = vpop.xlane.xlu1 %203  ;;  %v473_v34 = vmul.f32 0.00390625, %v2043_v50  ;;  %v719_v13 = vsel %vm623_vm7, %v718_v24, %v714_v58  ;;  %v631_v29 = vsel %vm630_vm8, %v629_v32, %v624_v33  ;;  %v723_v54 = vrot.slane %v443_v17, %v2084_v18  ;;  %v2375_v24 = vld [vmem:[#allocation11_spill] sm:$0xff] }
  0xfb   :  { %v2185_v5 = vpop.xlane.xlu0 %338  ;;  %v459_v49 = vmul.f32 0.00390625, %v2045_v52  ;;  %v867_v35 = vsel %vm609_vm5, %v866_v47, %v862_v48  ;;  %v444_v6 = vmul.f32 0.00390625, %v2047_v53  ;;  %v429_v30 = vmul.f32 0.00390625, %v2049_v55 }
  0xfc   :  { %v474_v50 = vmul.f32 0.00390625, %v2053_v57  ;;  %v636_v36 = vrot.slane %v428_v20, %v2090_v61  ;;  %v460_v38 = vmul.f32 0.00390625, %v2055_v2  ;;  %v445_v39 = vmul.f32 0.00390625, %v2371_v4 }
  0xfd   :  { %v430_v41 = vmul.f32 0.00390625, %v2372_v40  ;;  %v798_v52 = vsel %vm623_vm7, %v797_v60, %v793_v3  ;;  %v871_v9 = vrot.slane %v473_v34, %v2078_v14  ;;  %v475_v43 = vmul.f32 0.00390625, %v2373_v42 }
  0xfe   :  { %v2199_v11 = vpop.xlane.xlu1 %296  ;;  %v461_v53 = vmul.f32 0.00390625, %v2112_v0  ;;  %v724_v57 = vsel %vm630_vm8, %v723_v54, %v719_v13  ;;  %v802_v62 = vrot.slane %v459_v49, %v2084_v18  ;;  %v446_v63 = vmul.f32 0.00390625, %v2123_v10 }
  0xff   :  { %v2205_v19 = vpop.xlane.xlu0 %251  ;;  %v431_v2 = vmul.f32 0.00390625, %v2137_v51  ;;  %v728_v44 = vrot.slane %v444_v6, %v2090_v61  ;;  %v643_v27 = vrot.slane %v429_v30, %v2374_v45  ;;  %v876_v14 = vrot.slane %v474_v50, %v2081_v16 }
 0x100   :  { %v476_v22 = vmul.f32 0.00390625, %v2143_v7  ;;  %v638_v0 = vsel %vm637_vm9, %v636_v36, %v631_v29  ;;  %v807_v23 = vrot.slane %v460_v38, %v2090_v61  ;;  %v733_v46 = vrot.slane %v445_v39, %v2374_v45  ;;  %v2377_v39 = vld [vmem:[#allocation14_spill] sm:$0xff] }
 0x101   :  { %v650_v32 = vrot.slane %v430_v41, %v2375_v24  ;;  %v872_v10 = vsel %vm616_vm6, %v871_v9, %v867_v35  ;;  %v881_v51 = vrot.slane %v475_v43, %v2084_v18  ;;  %v812_v17 = vrot.slane %v461_v53, %v2374_v45 }
 0x102   :  { %v2219_v28 = vpop.xlane.xlu1 %206  ;;  %v462_v8 = vmul.f32 0.00390625, %v2159_v25  ;;  %v803_v7 = vsel %vm630_vm8, %v802_v62, %v798_v52  ;;  %v738_v12 = vrot.slane %v446_v63, %v2375_v24  ;;  %v657_v47 = vrot.slane %v431_v2, %v2376_v26 }
 0x103   :  { %v2225_v1 = vpop.xlane.xlu0 %341  ;;  %v447_v21 = vmul.f32 0.00390625, %v2165_v59  ;;  %v729_v33 = vsel %vm637_vm9, %v728_v44, %v724_v57  ;;  %v645_v20 = vsel %vm644_vm10, %v643_v27, %v638_v0  ;;  %v877_v18 = vsel %vm623_vm7, %v876_v14, %v872_v10 }
 0x104   :  { %v886_v48 = vrot.slane %v476_v22, %v2090_v61  ;;  %v808_v25 = vsel %vm637_vm9, %v807_v23, %v803_v7  ;;  %v734_v3 = vsel %vm644_vm10, %v733_v46, %v729_v33  ;;  %v652_v60 = vsel %vm651_vm11, %v650_v32, %v645_v20 }
 0x105   :  { %v432_v34 = vmul.f32 0.00390625, %v2179_v37  ;;  %v882_v13 = vsel %vm630_vm8, %v881_v51, %v877_v18  ;;  %v813_v59 = vsel %vm644_vm10, %v812_v17, %v808_v25  ;;  %v817_v29 = vrot.slane %v462_v8, %v2375_v24 }
 0x106   :  { %v300_v55 = vpop.xlane.xlu1 %299  ;;  %v463_v54 = vmul.f32 0.00390625, %v2199_v11  ;;  %v739_v35 = vsel %vm651_vm11, %v738_v12, %v734_v3  ;;  %v659_v61 = vsel %vm658_vm12, %v657_v47, %v652_v60  ;;  %v743_v6 = vrot.slane %v447_v21, %v2376_v26 }
 0x107   :  { %v255_v15 = vpop.xlane.xlu0 %254  ;;  %v448_v30 = vmul.f32 0.00390625, %v2205_v19  ;;  %v887_v37 = vsel %vm637_vm9, %v886_v48, %v882_v13  ;;  %v477_v36 = vmul.f32 0.00390625, %v2185_v5  ;;  %v464_v38 = vmul.f32 0.00390625, %v300_v55 }
 0x108   :  { %v449_v4 = vmul.f32 0.00390625, %v255_v15  ;;  %v664_v11 = vrot.slane %v432_v34, %v2377_v39  ;;  %v478_v40 = vmul.f32 0.00390625, %v2225_v1  ;;  %v818_v9 = vsel %vm651_vm11, %v817_v29, %v813_v59  ;;  %v2378_v15 = vld [vmem:[#allocation15_spill] sm:$0xff] }
 0x109   :  { %v822_v19 = vrot.slane %v463_v54, %v2376_v26  ;;  %v433_v42 = vmul.f32 0.00390625, %v2219_v28  ;;  %vm920_vm1 = vcmask 1042434   ;;  %v744_v5 = vsel %vm658_vm12, %v743_v6, %v739_v35  ;;  %v1624_v35 = vld [vmem:[%s2354_s2] ss:$0 sm:$0xff]  ;;  %s1873_s2 = smov [#allocation5]  }
 0x10a   :  { %v210_v16 = vpop.xlane.xlu1 %209  ;;  %v748_v55 = vrot.slane %v448_v30, %v2377_v39  ;;  %v891_v1 = vrot.slane %v477_v36, %v2374_v45  ;;  %v827_v2 = vrot.slane %v464_v38, %v2377_v39  ;;  %v753_v44 = vrot.slane %v449_v4, %v2378_v15 }
 0x10b   :  { %v345_v58 = vpop.xlane.xlu0 %344  ;;  %v434_v57 = vmul.f32 0.00390625, %v210_v16  ;;  %v666_v14 = vsel %vm665_vm13, %v664_v11, %v659_v61  ;;  %v896_v28 = vrot.slane %v478_v40, %v2375_v24  ;;  %v823_v23 = vsel %vm658_vm12, %v822_v19, %v818_v9 }
 0x10c   :  { %v479_v43 = vmul.f32 0.00390625, %v345_v58  ;;  %v671_v46 = vrot.slane %v433_v42, %v2378_v15  ;;  %v749_v51 = vsel %vm665_vm13, %v748_v55, %v744_v5  ;;  %v892_v7 = vsel %vm644_vm10, %v891_v1, %v887_v37  ;;  %v1625_v37 = vld [vmem:[%s2356_s4] ss:$0 sm:$0xff] }
 0x10d   :  { %v678_v17 = vrot.slane %v434_v57, %v2149_v31  ;;  %v828_v12 = vsel %vm665_vm13, %v827_v2, %v823_v23  ;;  %v754_v47 = vsel %vm672_vm14, %v753_v44, %v749_v51  ;;  %vm922_vm2 = vcmask 1043459   ;;  %v1697_v2 = vld [vmem:[#allocation2 + $0x18] sm:$0xff]  ;;  %v1698_v44 = vld [vmem:[#allocation2] sm:$0xff] }
 0x10e   :  { %v303_v49 = vpop.xlane.xlu1 %302  ;;  %v901_v32 = vrot.slane %v479_v43, %v2376_v26  ;;  %v897_v26 = vsel %vm651_vm11, %v896_v28, %v892_v7  ;;  %v673_v18 = vsel %vm672_vm14, %v671_v46, %v666_v14  ;;  %vm1004_vm3 = vcmask 64512   ;;  %v1699_v14 = vld [vmem:[#allocation2 + $0x8] sm:$0xff]  ;;  %v1700_v23 = vld [vmem:[#allocation2 + $0x20] sm:$0xff]  ;;  %v1704_v7 = vld [vmem:[#allocation2 + $0x30] sm:$0xff] }
 0x10f   :  { %v258_v50 = vpop.xlane.xlu0 %257  ;;  %v465_v41 = vmul.f32 0.00390625, %v303_v49  ;;  %v680_v60 = vsel %vm679_vm15, %v678_v17, %v673_v18  ;;  %v996_v49 = vld [vmem:[%s2355_s3] sm:$0xff]  ;;  %v1152_v42 = vsub.s32 1, %v2051_v56  ;;  %v1286_v55 = vsub.s32 3, %v2051_v56  ;;  %v1703_v17 = vld [vmem:[#allocation2 + $0x48] sm:$0xff]  ;;  %s1612_s3 = sshll.u32 %s1873_s2, 4  ;;  %s1613_s3 = int_to_ptr.vmem [resolvable:$true] %s1612_s3 }
 0x110   :  { %v450_v52 = vmul.f32 0.00390625, %v258_v50  ;;  %v902_v48 = vsel %vm658_vm12, %v901_v32, %v897_v26  ;;  %1682 = vmatpush3.msra.mxu1 %v996_v49  ;;  %v1701_v32 = vld [vmem:[#allocation2 + $0x28] sm:$0xff]  ;;  %v1706_v26 = vld [vmem:[#allocation2 + $0x60] sm:$0xff]  ;;  %s1844_s4 = scalar_lea.vmem %s1613_s3, 16384  ;;  %p1849_p6 = scmp.lt.s32.totalorder %s1613_s3, %s1613_s3 }
 0x111   :  { %v832_v22 = vrot.slane %v465_v41, %v2378_v15  ;;  %p1845_p5 = scmp.ne.s32.totalorder %s1613_s3, %s1844_s4  ;;  %p1850_p7 = scmp.lt.s32.totalorder %s1844_s4, %s1844_s4 }
 0x112   :  { %v306_v53 = vpop.xlane.xlu1 %305  ;;  %v758_v0 = vrot.slane %v450_v52, %v2149_v31  ;;  %v1085_v52 = vsub.s32 0, %v2051_v56 }
 0x113   :  { %v466_v62 = vmul.f32 0.00390625, %v306_v53  ;;  %v348_v63 = vpop.xlane.xlu0 %347  ;;  %v833_v58 = vsel %vm672_vm14, %v832_v22, %v828_v12  ;;  %v1219_v53 = vsub.s32 2, %v2051_v56  ;;  %p1851_p8 = por %p1850_p7, %p1849_p6 }
 0x114   :  { %v480_v27 = vmul.f32 0.00390625, %v348_v63  ;;  %v759_v33 = vsel %vm679_vm15, %v758_v0, %v754_v47  ;;  %v1696_v63 = vld [vmem:[#allocation2 + $0x10] sm:$0xff]  ;;  %v1705_v47 = vld [vmem:[#allocation2 + $0x38] sm:$0xff] }
 0x115   :  { %v837_v45 = vrot.slane %v466_v62, %v2149_v31  ;;  %v919_v59 = vsel %vm918_vm0, %v759_v33, %v680_v60  ;;  %v1707_v33 = vld [vmem:[#allocation2 + $0x68] sm:$0xff]  ;;  %v1709_v60 = vld [vmem:[#allocation2 + $0x58] sm:$0xff]  ;;  %p1852_p9 = pnand %p1851_p8, %p1845_p5 }
 0x116   :  { %v354_v10 = vpop.xlane.xlu1 %353  ;;  %v906_v8 = vrot.slane %v480_v27, %v2377_v39 }
 0x117   :  { %v351_v24 = vpop.xlane.xlu0 %350  ;;  %v482_v16 = vmul.f32 0.00390625, %v354_v10  ;;  %v838_v3 = vsel %vm679_vm15, %v837_v45, %v833_v58  ;;  %v1702_v10 = vld [vmem:[#allocation2 + $0x40] sm:$0xff] }
 0x118   :  { %v481_v21 = vmul.f32 0.00390625, %v351_v24  ;;  %v907_v34 = vsel %vm665_vm13, %v906_v8, %v902_v48 }
 0x119   :  { %v916_v20 = vrot.slane %v482_v16, %v2149_v31  ;;  %v921_v31 = vsel %vm920_vm1, %v838_v3, %v919_v59 }
 0x11a   :  { %v911_v25 = vrot.slane %v481_v21, %v2378_v15 }
 0x11c   :  { %v912_v13 = vsel %vm672_vm14, %v911_v25, %v907_v34  ;;  %v1708_v25 = vld [vmem:[#allocation2 + $0x50] sm:$0xff] }
 0x11d   :  { %v917_v29 = vsel %vm679_vm15, %v916_v20, %v912_v13  ;;  %v1710_v13 = vld [vmem:[#allocation2 + $0x80] sm:$0xff] }
 0x11e   :  { %v923_v54 = vsel %vm922_vm2, %v917_v29, %v921_v31  ;;  %v1711_v29 = vld [vmem:[#allocation2 + $0x88] sm:$0xff] }
 0x11f   :  { %1679 = vmatmul.mubr.f32.vlgmr.msra.gmra.mxu0 %v923_v54 }
 0x1df   :  { %v991_v61 = vpop.f32.mrf.mxu0 }
 0x1e0   :  { %v992_v6 = vadd.f32 %v1624_v35, %v991_v61  ;;  %v1712_v35 = vld [vmem:[#allocation2 + $0x70] sm:$0xff] }
 0x1e1   :  { %v1680_v30 = vpop.f32.mrf.mxu0 }
 0x1e2   :  { %v995_v50 = vmax.f32 %v992_v6, 0.0  ;;  %v1713_v6 = vld [vmem:[#allocation2 + $0x78] sm:$0xff] }
 0x1e4   :  { %1684 = vmatmul.mubr.msk.f32.vlgmr.msra.gmra.mxu1 %vm1004_vm3, %v995_v50  ;;  %v1714_v50 = vld [vmem:[#allocation2 + $0xa0] sm:$0xff] }
 0x2a4   :  { %v1074_v36 = vpop.f32.mrf.mxu1 }
 0x2a5   :  { %v1075_v38 = vadd.f32 %v1625_v37, %v1074_v36  ;;  %v1715_v36 = vld [vmem:[#allocation2 + $0xa8] sm:$0xff] }
 0x2a6   :  { %v1685_v4 = vpop.f32.mrf.mxu1 }
 0x2a7   :  { %v1078_v39 = vsub.f32 0.0, %v1075_v38 }
 0x2a9   :  { %v1079_v11 = vmul.f32 1.442695, %v1078_v39 }
 0x2ab   :  { %1692 = vpow2.f32 %v1079_v11  ;;  %v1716_v11 = vld [vmem:[#allocation2 + $0x90] sm:$0xff] }
 0x2b8   :  { %v1693_v40 = vpop.eup %1692 }
 0x2b9   :  { %v1081_v41 = vadd.f32 1.0, %v1693_v40 }
 0x2bb   :  { %1694 = vrcp.f32 %v1081_v41  ;;  %v1717_v41 = vld [vmem:[#allocation2 + $0x98] sm:$0xff] }
 0x2c8   :  { %v1695_v9 = vpop.eup %1694 }
 0x2c9   :  { %v1086_v19 = vrot.slane %v1695_v9, %v1085_v52  ;;  %v1153_v43 = vrot.slane %v1695_v9, %v1152_v42  ;;  %v1220_v5 = vrot.slane %v1695_v9, %v1219_v53  ;;  %v2328_v57 = vrot.slane %v1695_v9, %v1286_v55  ;;  %v1718_v9 = vld [vmem:[#allocation2 + $0xc0] sm:$0xff]  ;;  %v1719_v42 = vld [vmem:[#allocation2 + $0xc8] sm:$0xff]  ;;  %v1720_v55 = vld [vmem:[#allocation2 + $0xb0] sm:$0xff] }
 0x2cb   :  { %1092 = vbcast.lane.b32.xlu1 %v1086_v19, 264  ;;  %1088 = vbcast.lane.b32.xlu0 %v1086_v19, 256 }
 0x2cf   :  { %1096 = vbcast.lane.b32.xlu1 %v1086_v19, 272  ;;  %1104 = vbcast.lane.b32.xlu0 %v1086_v19, 288 }
 0x2d3   :  { %1100 = vbcast.lane.b32.xlu1 %v1086_v19, 280  ;;  %1112 = vbcast.lane.b32.xlu0 %v1086_v19, 304 }
 0x2d7   :  { %1108 = vbcast.lane.b32.xlu1 %v1086_v19, 296  ;;  %1120 = vbcast.lane.b32.xlu0 %v1086_v19, 320 }
 0x2db   :  { %1116 = vbcast.lane.b32.xlu1 %v1086_v19, 312  ;;  %1128 = vbcast.lane.b32.xlu0 %v1086_v19, 336 }
 0x2df   :  { %1124 = vbcast.lane.b32.xlu1 %v1086_v19, 328  ;;  %1136 = vbcast.lane.b32.xlu0 %v1086_v19, 352 }
 0x2e3   :  { %1132 = vbcast.lane.b32.xlu1 %v1086_v19, 344  ;;  %1144 = vbcast.lane.b32.xlu0 %v1086_v19, 368 }
 0x2e7   :  { %1140 = vbcast.lane.b32.xlu1 %v1086_v19, 360  ;;  %1155 = vbcast.lane.b32.xlu0 %v1153_v43, 256 }
 0x2eb   :  { %1148 = vbcast.lane.b32.xlu1 %v1086_v19, 376  ;;  %1163 = vbcast.lane.b32.xlu0 %v1153_v43, 272 }
 0x2ef   :  { %1159 = vbcast.lane.b32.xlu1 %v1153_v43, 264  ;;  %1171 = vbcast.lane.b32.xlu0 %v1153_v43, 288 }
 0x2f3   :  { %1167 = vbcast.lane.b32.xlu1 %v1153_v43, 280  ;;  %1179 = vbcast.lane.b32.xlu0 %v1153_v43, 304 }
 0x2f7   :  { %1175 = vbcast.lane.b32.xlu1 %v1153_v43, 296  ;;  %1187 = vbcast.lane.b32.xlu0 %v1153_v43, 320 }
 0x2fb   :  { %1183 = vbcast.lane.b32.xlu1 %v1153_v43, 312  ;;  %1195 = vbcast.lane.b32.xlu0 %v1153_v43, 336 }
 0x2ff   :  { %1191 = vbcast.lane.b32.xlu1 %v1153_v43, 328  ;;  %1203 = vbcast.lane.b32.xlu0 %v1153_v43, 352 }
 0x303   :  { %1199 = vbcast.lane.b32.xlu1 %v1153_v43, 344  ;;  %1211 = vbcast.lane.b32.xlu0 %v1153_v43, 368 }
 0x307   :  { %1207 = vbcast.lane.b32.xlu1 %v1153_v43, 360  ;;  %1222 = vbcast.lane.b32.xlu0 %v1220_v5, 256 }
 0x30b   :  { %1215 = vbcast.lane.b32.xlu1 %v1153_v43, 376  ;;  %1230 = vbcast.lane.b32.xlu0 %v1220_v5, 272 }
 0x30f   :  { %1226 = vbcast.lane.b32.xlu1 %v1220_v5, 264  ;;  %1238 = vbcast.lane.b32.xlu0 %v1220_v5, 288 }
 0x313   :  { %1234 = vbcast.lane.b32.xlu1 %v1220_v5, 280  ;;  %1246 = vbcast.lane.b32.xlu0 %v1220_v5, 304 }
 0x317   :  { %1242 = vbcast.lane.b32.xlu1 %v1220_v5, 296  ;;  %1254 = vbcast.lane.b32.xlu0 %v1220_v5, 320 }
 0x31b   :  { %1250 = vbcast.lane.b32.xlu1 %v1220_v5, 312  ;;  %1262 = vbcast.lane.b32.xlu0 %v1220_v5, 336 }
 0x31f   :  { %1258 = vbcast.lane.b32.xlu1 %v1220_v5, 328  ;;  %1270 = vbcast.lane.b32.xlu0 %v1220_v5, 352 }
 0x323   :  { %1266 = vbcast.lane.b32.xlu1 %v1220_v5, 344  ;;  %1278 = vbcast.lane.b32.xlu0 %v1220_v5, 368 }
 0x327   :  { %1274 = vbcast.lane.b32.xlu1 %v1220_v5, 360  ;;  %1289 = vbcast.lane.b32.xlu0 %v2328_v57, 256 }
 0x32b   :  { %1282 = vbcast.lane.b32.xlu1 %v1220_v5, 376  ;;  %1297 = vbcast.lane.b32.xlu0 %v2328_v57, 272 }
 0x32f   :  { %1293 = vbcast.lane.b32.xlu1 %v2328_v57, 264  ;;  %1305 = vbcast.lane.b32.xlu0 %v2328_v57, 288 }
 0x333   :  { %1301 = vbcast.lane.b32.xlu1 %v2328_v57, 280  ;;  %1313 = vbcast.lane.b32.xlu0 %v2328_v57, 304 }
 0x337   :  { %1309 = vbcast.lane.b32.xlu1 %v2328_v57, 296  ;;  %1321 = vbcast.lane.b32.xlu0 %v2328_v57, 320 }
 0x33b   :  { %1317 = vbcast.lane.b32.xlu1 %v2328_v57, 312  ;;  %1329 = vbcast.lane.b32.xlu0 %v2328_v57, 336 }
 0x33d   :  { %v1093_v56 = vpop.permute.xlu1 %1092  ;;  %v1089_v62 = vpop.permute.xlu0 %1088 }
 0x33e   :  { %v1353_v1 = vmul.f32 %v1696_v63, %v1093_v56  ;;  %v1354_v15 = vmul.f32 %v1697_v2, %v1093_v56  ;;  %v1351_v27 = vmul.f32 %v1698_v44, %v1089_v62  ;;  %v1352_v28 = vmul.f32 %v1699_v14, %v1089_v62  ;;  %v1721_v56 = vld [vmem:[#allocation2 + $0xb8] sm:$0xff]  ;;  %v1722_v63 = vld [vmem:[#allocation2 + $0xe0] sm:$0xff]  ;;  %v1723_v2 = vld [vmem:[#allocation2 + $0xe8] sm:$0xff] }
 0x33f   :  { %1325 = vbcast.lane.b32.xlu1 %v2328_v57, 328  ;;  %1337 = vbcast.lane.b32.xlu0 %v2328_v57, 352  ;;  %v1724_v14 = vld [vmem:[#allocation2 + $0xd0] sm:$0xff] }
 0x340   :  { %1481 = vst [vmem:[#allocation5 + $0x10] sm:$0xff] %v1353_v1  ;;  %1482 = vst [vmem:[#allocation5 + $0x18] sm:$0xff] %v1354_v15 }
 0x341   :  { %1479 = vst [vmem:[#allocation5] sm:$0xff] %v1351_v27  ;;  %1480 = vst [vmem:[#allocation5 + $0x8] sm:$0xff] %v1352_v28  ;;  %v1097_v22 = vpop.permute.xlu1 %1096  ;;  %v1105_v0 = vpop.permute.xlu0 %1104 }
 0x342   :  { %v1355_v46 = vmul.f32 %v1700_v23, %v1097_v22  ;;  %v1356_v45 = vmul.f32 %v1701_v32, %v1097_v22  ;;  %v1359_v51 = vmul.f32 %v1702_v10, %v1105_v0  ;;  %v1360_v8 = vmul.f32 %v1703_v17, %v1105_v0  ;;  %v1725_v22 = vld [vmem:[#allocation2 + $0xd8] sm:$0xff]  ;;  %v1726_v23 = vld [vmem:[#allocation2 + $0x100] sm:$0xff]  ;;  %v1727_v32 = vld [vmem:[#allocation2 + $0x108] sm:$0xff] }
 0x343   :  { %1333 = vbcast.lane.b32.xlu1 %v2328_v57, 344  ;;  %1345 = vbcast.lane.b32.xlu0 %v2328_v57, 368  ;;  %v1728_v17 = vld [vmem:[#allocation2 + $0xf0] sm:$0xff] }
 0x344   :  { %1483 = vst [vmem:[#allocation5 + $0x20] sm:$0xff] %v1355_v46  ;;  %1484 = vst [vmem:[#allocation5 + $0x28] sm:$0xff] %v1356_v45 }
 0x345   :  { %1487 = vst [vmem:[#allocation5 + $0x40] sm:$0xff] %v1359_v51  ;;  %1488 = vst [vmem:[#allocation5 + $0x48] sm:$0xff] %v1360_v8  ;;  %v1101_v24 = vpop.permute.xlu1 %1100  ;;  %v1113_v16 = vpop.permute.xlu0 %1112 }
 0x346   :  { %v1357_v12 = vmul.f32 %v1704_v7, %v1101_v24  ;;  %v1358_v21 = vmul.f32 %v1705_v47, %v1101_v24  ;;  %v1363_v58 = vmul.f32 %v1706_v26, %v1113_v16  ;;  %v1364_v20 = vmul.f32 %v1707_v33, %v1113_v16  ;;  %v1729_v24 = vld [vmem:[#allocation2 + $0xf8] sm:$0xff]  ;;  %v1730_v7 = vld [vmem:[#allocation2 + $0x120] sm:$0xff]  ;;  %v1731_v47 = vld [vmem:[#allocation2 + $0x128] sm:$0xff] }
 0x347   :  { %1341 = vbcast.lane.b32.xlu1 %v2328_v57, 360  ;;  %v1732_v33 = vld [vmem:[#allocation2 + $0x110] sm:$0xff] }
 0x348   :  { %1485 = vst [vmem:[#allocation5 + $0x30] sm:$0xff] %v1357_v12  ;;  %1486 = vst [vmem:[#allocation5 + $0x38] sm:$0xff] %v1358_v21 }
 0x349   :  { %1491 = vst [vmem:[#allocation5 + $0x60] sm:$0xff] %v1363_v58  ;;  %1492 = vst [vmem:[#allocation5 + $0x68] sm:$0xff] %v1364_v20  ;;  %v1109_v18 = vpop.permute.xlu1 %1108  ;;  %v1121_v48 = vpop.permute.xlu0 %1120 }
 0x34a   :  { %v1361_v3 = vmul.f32 %v1708_v25, %v1109_v18  ;;  %v1362_v34 = vmul.f32 %v1709_v60, %v1109_v18  ;;  %v1367_v59 = vmul.f32 %v1710_v13, %v1121_v48  ;;  %v1368_v31 = vmul.f32 %v1711_v29, %v1121_v48  ;;  %v1733_v18 = vld [vmem:[#allocation2 + $0x118] sm:$0xff]  ;;  %v1734_v25 = vld [vmem:[#allocation2 + $0x140] sm:$0xff]  ;;  %v1735_v60 = vld [vmem:[#allocation2 + $0x148] sm:$0xff] }
 0x34b   :  { %1349 = vbcast.lane.b32.xlu1 %v2328_v57, 376  ;;  %v1736_v29 = vld [vmem:[#allocation2 + $0x130] sm:$0xff] }
 0x34c   :  { %1489 = vst [vmem:[#allocation5 + $0x50] sm:$0xff] %v1361_v3  ;;  %1490 = vst [vmem:[#allocation5 + $0x58] sm:$0xff] %v1362_v34 }
 0x34d   :  { %1495 = vst [vmem:[#allocation5 + $0x80] sm:$0xff] %v1367_v59  ;;  %1496 = vst [vmem:[#allocation5 + $0x88] sm:$0xff] %v1368_v31  ;;  %v1117_v54 = vpop.permute.xlu1 %1116  ;;  %v1129_v49 = vpop.permute.xlu0 %1128 }
 0x34e   :  { %v1365_v61 = vmul.f32 %v1712_v35, %v1117_v54  ;;  %v1366_v30 = vmul.f32 %v1713_v6, %v1117_v54  ;;  %v1371_v37 = vmul.f32 %v1714_v50, %v1129_v49  ;;  %v1372_v38 = vmul.f32 %v1715_v36, %v1129_v49  ;;  %v1737_v54 = vld [vmem:[#allocation2 + $0x138] sm:$0xff]  ;;  %v1738_v35 = vld [vmem:[#allocation2 + $0x160] sm:$0xff]  ;;  %v1739_v6 = vld [vmem:[#allocation2 + $0x168] sm:$0xff] }
 0x34f   :  { %v1740_v36 = vld [vmem:[#allocation2 + $0x150] sm:$0xff] }
 0x350   :  { %1493 = vst [vmem:[#allocation5 + $0x70] sm:$0xff] %v1365_v61  ;;  %1494 = vst [vmem:[#allocation5 + $0x78] sm:$0xff] %v1366_v30 }
 0x351   :  { %1499 = vst [vmem:[#allocation5 + $0xa0] sm:$0xff] %v1371_v37  ;;  %1500 = vst [vmem:[#allocation5 + $0xa8] sm:$0xff] %v1372_v38  ;;  %v1125_v4 = vpop.permute.xlu1 %1124  ;;  %v1137_v39 = vpop.permute.xlu0 %1136 }
 0x352   :  { %v1369_v40 = vmul.f32 %v1716_v11, %v1125_v4  ;;  %v1370_v52 = vmul.f32 %v1717_v41, %v1125_v4  ;;  %v1375_v19 = vmul.f32 %v1718_v9, %v1137_v39  ;;  %v1376_v43 = vmul.f32 %v1719_v42, %v1137_v39  ;;  %v1741_v4 = vld [vmem:[#allocation2 + $0x158] sm:$0xff]  ;;  %v1742_v11 = vld [vmem:[#allocation2 + $0x180] sm:$0xff]  ;;  %v1743_v41 = vld [vmem:[#allocation2 + $0x188] sm:$0xff] }
 0x353   :  { %v1744_v42 = vld [vmem:[#allocation2 + $0x170] sm:$0xff] }
 0x354   :  { %1497 = vst [vmem:[#allocation5 + $0x90] sm:$0xff] %v1369_v40  ;;  %1498 = vst [vmem:[#allocation5 + $0x98] sm:$0xff] %v1370_v52 }
 0x355   :  { %1503 = vst [vmem:[#allocation5 + $0xc0] sm:$0xff] %v1375_v19  ;;  %1504 = vst [vmem:[#allocation5 + $0xc8] sm:$0xff] %v1376_v43  ;;  %v1133_v53 = vpop.permute.xlu1 %1132  ;;  %v1145_v5 = vpop.permute.xlu0 %1144 }
 0x356   :  { %v1373_v57 = vmul.f32 %v1720_v55, %v1133_v53  ;;  %v1374_v62 = vmul.f32 %v1721_v56, %v1133_v53  ;;  %v1379_v1 = vmul.f32 %v1722_v63, %v1145_v5  ;;  %v1380_v15 = vmul.f32 %v1723_v2, %v1145_v5  ;;  %v1745_v53 = vld [vmem:[#allocation2 + $0x178] sm:$0xff]  ;;  %v1746_v55 = vld [vmem:[#allocation2 + $0x1a0] sm:$0xff]  ;;  %v1747_v56 = vld [vmem:[#allocation2 + $0x1a8] sm:$0xff] }
 0x357   :  { %v1748_v2 = vld [vmem:[#allocation2 + $0x190] sm:$0xff] }
 0x358   :  { %1501 = vst [vmem:[#allocation5 + $0xb0] sm:$0xff] %v1373_v57  ;;  %1502 = vst [vmem:[#allocation5 + $0xb8] sm:$0xff] %v1374_v62 }
 0x359   :  { %1507 = vst [vmem:[#allocation5 + $0xe0] sm:$0xff] %v1379_v1  ;;  %1508 = vst [vmem:[#allocation5 + $0xe8] sm:$0xff] %v1380_v15  ;;  %v1141_v44 = vpop.permute.xlu1 %1140  ;;  %v1156_v27 = vpop.permute.xlu0 %1155 }
 0x35a   :  { %v1377_v28 = vmul.f32 %v1724_v14, %v1141_v44  ;;  %v1378_v0 = vmul.f32 %v1725_v22, %v1141_v44  ;;  %v1383_v46 = vmul.f32 %v1726_v23, %v1156_v27  ;;  %v1384_v45 = vmul.f32 %v1727_v32, %v1156_v27  ;;  %v1749_v44 = vld [vmem:[#allocation2 + $0x198] sm:$0xff]  ;;  %v1750_v14 = vld [vmem:[#allocation2 + $0x1c0] sm:$0xff]  ;;  %v1751_v22 = vld [vmem:[#allocation2 + $0x1c8] sm:$0xff] }
 0x35b   :  { %v1752_v32 = vld [vmem:[#allocation2 + $0x1b0] sm:$0xff] }
 0x35c   :  { %1505 = vst [vmem:[#allocation5 + $0xd0] sm:$0xff] %v1377_v28  ;;  %1506 = vst [vmem:[#allocation5 + $0xd8] sm:$0xff] %v1378_v0 }
 0x35d   :  { %1511 = vst [vmem:[#allocation5 + $0x100] sm:$0xff] %v1383_v46  ;;  %1512 = vst [vmem:[#allocation5 + $0x108] sm:$0xff] %v1384_v45  ;;  %v1149_v10 = vpop.permute.xlu1 %1148  ;;  %v1164_v51 = vpop.permute.xlu0 %1163 }
 0x35e   :  { %v1381_v8 = vmul.f32 %v1728_v17, %v1149_v10  ;;  %v1382_v16 = vmul.f32 %v1729_v24, %v1149_v10  ;;  %v1387_v12 = vmul.f32 %v1730_v7, %v1164_v51  ;;  %v1388_v21 = vmul.f32 %v1731_v47, %v1164_v51  ;;  %v1753_v10 = vld [vmem:[#allocation2 + $0x1b8] sm:$0xff]  ;;  %v1754_v17 = vld [vmem:[#allocation2 + $0x1e0] sm:$0xff]  ;;  %v1755_v24 = vld [vmem:[#allocation2 + $0x1e8] sm:$0xff] }
 0x35f   :  { %v1756_v47 = vld [vmem:[#allocation2 + $0x1d0] sm:$0xff] }
 0x360   :  { %1509 = vst [vmem:[#allocation5 + $0xf0] sm:$0xff] %v1381_v8  ;;  %1510 = vst [vmem:[#allocation5 + $0xf8] sm:$0xff] %v1382_v16 }
 0x361   :  { %1515 = vst [vmem:[#allocation5 + $0x120] sm:$0xff] %v1387_v12  ;;  %1516 = vst [vmem:[#allocation5 + $0x128] sm:$0xff] %v1388_v21  ;;  %v1160_v26 = vpop.permute.xlu1 %1159  ;;  %v1172_v58 = vpop.permute.xlu0 %1171 }
 0x362   :  { %v1385_v20 = vmul.f32 %v1732_v33, %v1160_v26  ;;  %v1386_v48 = vmul.f32 %v1733_v18, %v1160_v26  ;;  %v1391_v3 = vmul.f32 %v1734_v25, %v1172_v58  ;;  %v1392_v34 = vmul.f32 %v1735_v60, %v1172_v58  ;;  %v1757_v26 = vld [vmem:[#allocation2 + $0x1d8] sm:$0xff]  ;;  %v1758_v33 = vld [vmem:[#allocation2 + $0x200] sm:$0xff]  ;;  %v1759_v18 = vld [vmem:[#allocation2 + $0x208] sm:$0xff] }
 0x363   :  { %v1760_v60 = vld [vmem:[#allocation2 + $0x1f0] sm:$0xff] }
 0x364   :  { %1513 = vst [vmem:[#allocation5 + $0x110] sm:$0xff] %v1385_v20  ;;  %1514 = vst [vmem:[#allocation5 + $0x118] sm:$0xff] %v1386_v48 }
 0x365   :  { %1519 = vst [vmem:[#allocation5 + $0x140] sm:$0xff] %v1391_v3  ;;  %1520 = vst [vmem:[#allocation5 + $0x148] sm:$0xff] %v1392_v34  ;;  %v1168_v13 = vpop.permute.xlu1 %1167  ;;  %v1180_v59 = vpop.permute.xlu0 %1179 }
 0x366   :  { %v1389_v31 = vmul.f32 %v1736_v29, %v1168_v13  ;;  %v1390_v49 = vmul.f32 %v1737_v54, %v1168_v13  ;;  %v1395_v61 = vmul.f32 %v1738_v35, %v1180_v59  ;;  %v1396_v30 = vmul.f32 %v1739_v6, %v1180_v59  ;;  %v1761_v13 = vld [vmem:[#allocation2 + $0x1f8] sm:$0xff]  ;;  %v1762_v29 = vld [vmem:[#allocation2 + $0x220] sm:$0xff]  ;;  %v1763_v54 = vld [vmem:[#allocation2 + $0x228] sm:$0xff] }
 0x367   :  { %v1764_v6 = vld [vmem:[#allocation2 + $0x210] sm:$0xff] }
 0x368   :  { %1517 = vst [vmem:[#allocation5 + $0x130] sm:$0xff] %v1389_v31  ;;  %1518 = vst [vmem:[#allocation5 + $0x138] sm:$0xff] %v1390_v49 }
 0x369   :  { %1523 = vst [vmem:[#allocation5 + $0x160] sm:$0xff] %v1395_v61  ;;  %1524 = vst [vmem:[#allocation5 + $0x168] sm:$0xff] %v1396_v30  ;;  %v1176_v50 = vpop.permute.xlu1 %1175  ;;  %v1188_v37 = vpop.permute.xlu0 %1187 }
 0x36a   :  { %v1393_v38 = vmul.f32 %v1740_v36, %v1176_v50  ;;  %v1394_v39 = vmul.f32 %v1741_v4, %v1176_v50  ;;  %v1399_v40 = vmul.f32 %v1742_v11, %v1188_v37  ;;  %v1400_v52 = vmul.f32 %v1743_v41, %v1188_v37  ;;  %v1765_v50 = vld [vmem:[#allocation2 + $0x218] sm:$0xff]  ;;  %v1766_v36 = vld [vmem:[#allocation2 + $0x240] sm:$0xff]  ;;  %v1767_v4 = vld [vmem:[#allocation2 + $0x248] sm:$0xff] }
 0x36b   :  { %v1768_v41 = vld [vmem:[#allocation2 + $0x230] sm:$0xff] }
 0x36c   :  { %1521 = vst [vmem:[#allocation5 + $0x150] sm:$0xff] %v1393_v38  ;;  %1522 = vst [vmem:[#allocation5 + $0x158] sm:$0xff] %v1394_v39 }
 0x36d   :  { %1527 = vst [vmem:[#allocation5 + $0x180] sm:$0xff] %v1399_v40  ;;  %1528 = vst [vmem:[#allocation5 + $0x188] sm:$0xff] %v1400_v52  ;;  %v1184_v9 = vpop.permute.xlu1 %1183  ;;  %v1196_v19 = vpop.permute.xlu0 %1195 }
 0x36e   :  { %v1397_v43 = vmul.f32 %v1744_v42, %v1184_v9  ;;  %v1398_v5 = vmul.f32 %v1745_v53, %v1184_v9  ;;  %v1403_v57 = vmul.f32 %v1746_v55, %v1196_v19  ;;  %v1404_v62 = vmul.f32 %v1747_v56, %v1196_v19  ;;  %v1769_v9 = vld [vmem:[#allocation2 + $0x238] sm:$0xff]  ;;  %v1770_v42 = vld [vmem:[#allocation2 + $0x260] sm:$0xff]  ;;  %v1771_v53 = vld [vmem:[#allocation2 + $0x268] sm:$0xff] }
 0x36f   :  { %v1772_v56 = vld [vmem:[#allocation2 + $0x250] sm:$0xff] }
 0x370   :  { %1525 = vst [vmem:[#allocation5 + $0x170] sm:$0xff] %v1397_v43  ;;  %1526 = vst [vmem:[#allocation5 + $0x178] sm:$0xff] %v1398_v5 }
 0x371   :  { %1531 = vst [vmem:[#allocation5 + $0x1a0] sm:$0xff] %v1403_v57  ;;  %1532 = vst [vmem:[#allocation5 + $0x1a8] sm:$0xff] %v1404_v62  ;;  %v1192_v63 = vpop.permute.xlu1 %1191  ;;  %v1204_v1 = vpop.permute.xlu0 %1203 }
 0x372   :  { %v1401_v15 = vmul.f32 %v1748_v2, %v1192_v63  ;;  %v1402_v27 = vmul.f32 %v1749_v44, %v1192_v63  ;;  %v1407_v28 = vmul.f32 %v1750_v14, %v1204_v1  ;;  %v1408_v0 = vmul.f32 %v1751_v22, %v1204_v1  ;;  %v1773_v63 = vld [vmem:[#allocation2 + $0x258] sm:$0xff]  ;;  %v1774_v2 = vld [vmem:[#allocation2 + $0x280] sm:$0xff]  ;;  %v1775_v44 = vld [vmem:[#allocation2 + $0x288] sm:$0xff] }
 0x373   :  { %v1776_v22 = vld [vmem:[#allocation2 + $0x270] sm:$0xff] }
 0x374   :  { %1529 = vst [vmem:[#allocation5 + $0x190] sm:$0xff] %v1401_v15  ;;  %1530 = vst [vmem:[#allocation5 + $0x198] sm:$0xff] %v1402_v27 }
 0x375   :  { %1535 = vst [vmem:[#allocation5 + $0x1c0] sm:$0xff] %v1407_v28  ;;  %1536 = vst [vmem:[#allocation5 + $0x1c8] sm:$0xff] %v1408_v0  ;;  %v1200_v23 = vpop.permute.xlu1 %1199  ;;  %v1212_v46 = vpop.permute.xlu0 %1211 }
 0x376   :  { %v1405_v45 = vmul.f32 %v1752_v32, %v1200_v23  ;;  %v1406_v51 = vmul.f32 %v1753_v10, %v1200_v23  ;;  %v1411_v8 = vmul.f32 %v1754_v17, %v1212_v46  ;;  %v1412_v16 = vmul.f32 %v1755_v24, %v1212_v46  ;;  %v1777_v23 = vld [vmem:[#allocation2 + $0x278] sm:$0xff]  ;;  %v1778_v32 = vld [vmem:[#allocation2 + $0x2a0] sm:$0xff]  ;;  %v1779_v10 = vld [vmem:[#allocation2 + $0x2a8] sm:$0xff] }
 0x377   :  { %v1780_v24 = vld [vmem:[#allocation2 + $0x290] sm:$0xff] }
 0x378   :  { %1533 = vst [vmem:[#allocation5 + $0x1b0] sm:$0xff] %v1405_v45  ;;  %1534 = vst [vmem:[#allocation5 + $0x1b8] sm:$0xff] %v1406_v51 }
 0x379   :  { %1539 = vst [vmem:[#allocation5 + $0x1e0] sm:$0xff] %v1411_v8  ;;  %1540 = vst [vmem:[#allocation5 + $0x1e8] sm:$0xff] %v1412_v16  ;;  %v1208_v7 = vpop.permute.xlu1 %1207  ;;  %v1223_v12 = vpop.permute.xlu0 %1222 }
 0x37a   :  { %v1409_v21 = vmul.f32 %v1756_v47, %v1208_v7  ;;  %v1410_v58 = vmul.f32 %v1757_v26, %v1208_v7  ;;  %v1415_v20 = vmul.f32 %v1758_v33, %v1223_v12  ;;  %v1416_v48 = vmul.f32 %v1759_v18, %v1223_v12  ;;  %v1781_v7 = vld [vmem:[#allocation2 + $0x298] sm:$0xff]  ;;  %v1782_v47 = vld [vmem:[#allocation2 + $0x2c0] sm:$0xff]  ;;  %v1783_v26 = vld [vmem:[#allocation2 + $0x2c8] sm:$0xff] }
 0x37b   :  { %v1784_v18 = vld [vmem:[#allocation2 + $0x2b0] sm:$0xff] }
 0x37c   :  { %1537 = vst [vmem:[#allocation5 + $0x1d0] sm:$0xff] %v1409_v21  ;;  %1538 = vst [vmem:[#allocation5 + $0x1d8] sm:$0xff] %v1410_v58 }
 0x37d   :  { %1543 = vst [vmem:[#allocation5 + $0x200] sm:$0xff] %v1415_v20  ;;  %1544 = vst [vmem:[#allocation5 + $0x208] sm:$0xff] %v1416_v48  ;;  %v1216_v25 = vpop.permute.xlu1 %1215  ;;  %v1231_v3 = vpop.permute.xlu0 %1230 }
 0x37e   :  { %v1413_v34 = vmul.f32 %v1760_v60, %v1216_v25  ;;  %v1414_v59 = vmul.f32 %v1761_v13, %v1216_v25  ;;  %v1419_v31 = vmul.f32 %v1762_v29, %v1231_v3  ;;  %v1420_v49 = vmul.f32 %v1763_v54, %v1231_v3  ;;  %v1785_v25 = vld [vmem:[#allocation2 + $0x2b8] sm:$0xff]  ;;  %v1786_v60 = vld [vmem:[#allocation2 + $0x2e0] sm:$0xff]  ;;  %v1787_v13 = vld [vmem:[#allocation2 + $0x2e8] sm:$0xff] }
 0x37f   :  { %v1788_v54 = vld [vmem:[#allocation2 + $0x2d0] sm:$0xff] }
 0x380   :  { %1541 = vst [vmem:[#allocation5 + $0x1f0] sm:$0xff] %v1413_v34  ;;  %1542 = vst [vmem:[#allocation5 + $0x1f8] sm:$0xff] %v1414_v59 }
 0x381   :  { %1547 = vst [vmem:[#allocation5 + $0x220] sm:$0xff] %v1419_v31  ;;  %1548 = vst [vmem:[#allocation5 + $0x228] sm:$0xff] %v1420_v49  ;;  %v1227_v35 = vpop.permute.xlu1 %1226  ;;  %v1239_v61 = vpop.permute.xlu0 %1238 }
 0x382   :  { %v1417_v30 = vmul.f32 %v1764_v6, %v1227_v35  ;;  %v1418_v37 = vmul.f32 %v1765_v50, %v1227_v35  ;;  %v1423_v38 = vmul.f32 %v1766_v36, %v1239_v61  ;;  %v1424_v39 = vmul.f32 %v1767_v4, %v1239_v61  ;;  %v1789_v35 = vld [vmem:[#allocation2 + $0x2d8] sm:$0xff]  ;;  %v1790_v6 = vld [vmem:[#allocation2 + $0x300] sm:$0xff]  ;;  %v1791_v50 = vld [vmem:[#allocation2 + $0x308] sm:$0xff] }
 0x383   :  { %v1792_v4 = vld [vmem:[#allocation2 + $0x2f0] sm:$0xff] }
 0x384   :  { %1545 = vst [vmem:[#allocation5 + $0x210] sm:$0xff] %v1417_v30  ;;  %1546 = vst [vmem:[#allocation5 + $0x218] sm:$0xff] %v1418_v37 }
 0x385   :  { %1551 = vst [vmem:[#allocation5 + $0x240] sm:$0xff] %v1423_v38  ;;  %1552 = vst [vmem:[#allocation5 + $0x248] sm:$0xff] %v1424_v39  ;;  %v1235_v11 = vpop.permute.xlu1 %1234  ;;  %v1247_v40 = vpop.permute.xlu0 %1246 }
 0x386   :  { %v1421_v52 = vmul.f32 %v1768_v41, %v1235_v11  ;;  %v1422_v19 = vmul.f32 %v1769_v9, %v1235_v11  ;;  %v1427_v43 = vmul.f32 %v1770_v42, %v1247_v40  ;;  %v1428_v5 = vmul.f32 %v1771_v53, %v1247_v40  ;;  %v1793_v11 = vld [vmem:[#allocation2 + $0x2f8] sm:$0xff]  ;;  %v1794_v41 = vld [vmem:[#allocation2 + $0x320] sm:$0xff]  ;;  %v1795_v9 = vld [vmem:[#allocation2 + $0x328] sm:$0xff] }
 0x387   :  { %v1796_v53 = vld [vmem:[#allocation2 + $0x310] sm:$0xff] }
 0x388   :  { %1549 = vst [vmem:[#allocation5 + $0x230] sm:$0xff] %v1421_v52  ;;  %1550 = vst [vmem:[#allocation5 + $0x238] sm:$0xff] %v1422_v19 }
 0x389   :  { %1555 = vst [vmem:[#allocation5 + $0x260] sm:$0xff] %v1427_v43  ;;  %1556 = vst [vmem:[#allocation5 + $0x268] sm:$0xff] %v1428_v5  ;;  %v1243_v55 = vpop.permute.xlu1 %1242  ;;  %v1255_v57 = vpop.permute.xlu0 %1254 }
 0x38a   :  { %v1425_v62 = vmul.f32 %v1772_v56, %v1243_v55  ;;  %v1426_v1 = vmul.f32 %v1773_v63, %v1243_v55  ;;  %v1431_v15 = vmul.f32 %v1774_v2, %v1255_v57  ;;  %v1432_v27 = vmul.f32 %v1775_v44, %v1255_v57  ;;  %v1797_v55 = vld [vmem:[#allocation2 + $0x318] sm:$0xff]  ;;  %v1798_v56 = vld [vmem:[#allocation2 + $0x340] sm:$0xff]  ;;  %v1799_v63 = vld [vmem:[#allocation2 + $0x348] sm:$0xff] }
 0x38b   :  { %v1800_v44 = vld [vmem:[#allocation2 + $0x330] sm:$0xff] }
 0x38c   :  { %1553 = vst [vmem:[#allocation5 + $0x250] sm:$0xff] %v1425_v62  ;;  %1554 = vst [vmem:[#allocation5 + $0x258] sm:$0xff] %v1426_v1 }
 0x38d   :  { %1559 = vst [vmem:[#allocation5 + $0x280] sm:$0xff] %v1431_v15  ;;  %1560 = vst [vmem:[#allocation5 + $0x288] sm:$0xff] %v1432_v27  ;;  %v1251_v14 = vpop.permute.xlu1 %1250  ;;  %v1263_v28 = vpop.permute.xlu0 %1262 }
 0x38e   :  { %v1429_v0 = vmul.f32 %v1776_v22, %v1251_v14  ;;  %v1430_v46 = vmul.f32 %v1777_v23, %v1251_v14  ;;  %v1435_v45 = vmul.f32 %v1778_v32, %v1263_v28  ;;  %v1436_v51 = vmul.f32 %v1779_v10, %v1263_v28  ;;  %v1801_v14 = vld [vmem:[#allocation2 + $0x338] sm:$0xff]  ;;  %v1802_v22 = vld [vmem:[#allocation2 + $0x360] sm:$0xff]  ;;  %v1803_v23 = vld [vmem:[#allocation2 + $0x368] sm:$0xff] }
 0x38f   :  { %v1804_v10 = vld [vmem:[#allocation2 + $0x350] sm:$0xff] }
 0x390   :  { %1557 = vst [vmem:[#allocation5 + $0x270] sm:$0xff] %v1429_v0  ;;  %1558 = vst [vmem:[#allocation5 + $0x278] sm:$0xff] %v1430_v46 }
 0x391   :  { %1563 = vst [vmem:[#allocation5 + $0x2a0] sm:$0xff] %v1435_v45  ;;  %1564 = vst [vmem:[#allocation5 + $0x2a8] sm:$0xff] %v1436_v51  ;;  %v1259_v17 = vpop.permute.xlu1 %1258  ;;  %v1271_v8 = vpop.permute.xlu0 %1270 }
 0x392   :  { %v1433_v16 = vmul.f32 %v1780_v24, %v1259_v17  ;;  %v1434_v12 = vmul.f32 %v1781_v7, %v1259_v17  ;;  %v1439_v21 = vmul.f32 %v1782_v47, %v1271_v8  ;;  %v1440_v58 = vmul.f32 %v1783_v26, %v1271_v8  ;;  %v1805_v17 = vld [vmem:[#allocation2 + $0x358] sm:$0xff]  ;;  %v1806_v24 = vld [vmem:[#allocation2 + $0x380] sm:$0xff]  ;;  %v1807_v7 = vld [vmem:[#allocation2 + $0x388] sm:$0xff] }
 0x393   :  { %v1808_v26 = vld [vmem:[#allocation2 + $0x370] sm:$0xff] }
 0x394   :  { %1561 = vst [vmem:[#allocation5 + $0x290] sm:$0xff] %v1433_v16  ;;  %1562 = vst [vmem:[#allocation5 + $0x298] sm:$0xff] %v1434_v12 }
 0x395   :  { %1567 = vst [vmem:[#allocation5 + $0x2c0] sm:$0xff] %v1439_v21  ;;  %1568 = vst [vmem:[#allocation5 + $0x2c8] sm:$0xff] %v1440_v58  ;;  %v1267_v33 = vpop.permute.xlu1 %1266  ;;  %v1279_v20 = vpop.permute.xlu0 %1278 }
 0x396   :  { %v1437_v48 = vmul.f32 %v1784_v18, %v1267_v33  ;;  %v1438_v3 = vmul.f32 %v1785_v25, %v1267_v33  ;;  %v1443_v34 = vmul.f32 %v1786_v60, %v1279_v20  ;;  %v1444_v59 = vmul.f32 %v1787_v13, %v1279_v20  ;;  %v1809_v33 = vld [vmem:[#allocation2 + $0x378] sm:$0xff]  ;;  %v1810_v18 = vld [vmem:[#allocation2 + $0x3a0] sm:$0xff]  ;;  %v1811_v25 = vld [vmem:[#allocation2 + $0x3a8] sm:$0xff] }
 0x397   :  { %v1812_v13 = vld [vmem:[#allocation2 + $0x390] sm:$0xff] }
 0x398   :  { %1565 = vst [vmem:[#allocation5 + $0x2b0] sm:$0xff] %v1437_v48  ;;  %1566 = vst [vmem:[#allocation5 + $0x2b8] sm:$0xff] %v1438_v3 }
 0x399   :  { %1571 = vst [vmem:[#allocation5 + $0x2e0] sm:$0xff] %v1443_v34  ;;  %1572 = vst [vmem:[#allocation5 + $0x2e8] sm:$0xff] %v1444_v59  ;;  %v1275_v29 = vpop.permute.xlu1 %1274  ;;  %v1290_v31 = vpop.permute.xlu0 %1289 }
 0x39a   :  { %v1441_v49 = vmul.f32 %v1788_v54, %v1275_v29  ;;  %v1442_v61 = vmul.f32 %v1789_v35, %v1275_v29  ;;  %v1447_v30 = vmul.f32 %v1790_v6, %v1290_v31  ;;  %v1448_v37 = vmul.f32 %v1791_v50, %v1290_v31  ;;  %v1813_v29 = vld [vmem:[#allocation2 + $0x398] sm:$0xff]  ;;  %v1814_v54 = vld [vmem:[#allocation2 + $0x3c0] sm:$0xff]  ;;  %v1815_v35 = vld [vmem:[#allocation2 + $0x3c8] sm:$0xff] }
 0x39b   :  { %v1816_v50 = vld [vmem:[#allocation2 + $0x3b0] sm:$0xff] }
 0x39c   :  { %1569 = vst [vmem:[#allocation5 + $0x2d0] sm:$0xff] %v1441_v49  ;;  %1570 = vst [vmem:[#allocation5 + $0x2d8] sm:$0xff] %v1442_v61 }
 0x39d   :  { %1575 = vst [vmem:[#allocation5 + $0x300] sm:$0xff] %v1447_v30  ;;  %1576 = vst [vmem:[#allocation5 + $0x308] sm:$0xff] %v1448_v37  ;;  %v1283_v36 = vpop.permute.xlu1 %1282  ;;  %v1298_v38 = vpop.permute.xlu0 %1297 }
 0x39e   :  { %v1445_v39 = vmul.f32 %v1792_v4, %v1283_v36  ;;  %v1446_v40 = vmul.f32 %v1793_v11, %v1283_v36  ;;  %v1451_v52 = vmul.f32 %v1794_v41, %v1298_v38  ;;  %v1452_v19 = vmul.f32 %v1795_v9, %v1298_v38  ;;  %v1817_v36 = vld [vmem:[#allocation2 + $0x3b8] sm:$0xff]  ;;  %v1818_v4 = vld [vmem:[#allocation2 + $0x3e0] sm:$0xff]  ;;  %v1819_v11 = vld [vmem:[#allocation2 + $0x3e8] sm:$0xff] }
 0x3a0   :  { %1573 = vst [vmem:[#allocation5 + $0x2f0] sm:$0xff] %v1445_v39  ;;  %1574 = vst [vmem:[#allocation5 + $0x2f8] sm:$0xff] %v1446_v40 }
 0x3a1   :  { %1579 = vst [vmem:[#allocation5 + $0x320] sm:$0xff] %v1451_v52  ;;  %1580 = vst [vmem:[#allocation5 + $0x328] sm:$0xff] %v1452_v19  ;;  %v1294_v42 = vpop.permute.xlu1 %1293  ;;  %v1306_v43 = vpop.permute.xlu0 %1305  ;;  %v1820_v52 = vld [vmem:[#allocation2 + $0x3d0] sm:$0xff]  ;;  %v1821_v19 = vld [vmem:[#allocation2 + $0x3d8] sm:$0xff] }
 0x3a2   :  { %v1449_v5 = vmul.f32 %v1796_v53, %v1294_v42  ;;  %v1450_v57 = vmul.f32 %v1797_v55, %v1294_v42  ;;  %v1455_v62 = vmul.f32 %v1798_v56, %v1306_v43  ;;  %v1456_v1 = vmul.f32 %v1799_v63, %v1306_v43  ;;  %v1822_v53 = vld [vmem:[#allocation2 + $0x3f0] sm:$0xff]  ;;  %v1823_v55 = vld [vmem:[#allocation2 + $0x3f8] sm:$0xff] }
 0x3a4   :  { %1577 = vst [vmem:[#allocation5 + $0x310] sm:$0xff] %v1449_v5  ;;  %1578 = vst [vmem:[#allocation5 + $0x318] sm:$0xff] %v1450_v57 }
 0x3a5   :  { %1583 = vst [vmem:[#allocation5 + $0x340] sm:$0xff] %v1455_v62  ;;  %1584 = vst [vmem:[#allocation5 + $0x348] sm:$0xff] %v1456_v1  ;;  %v1302_v2 = vpop.permute.xlu1 %1301  ;;  %v1314_v15 = vpop.permute.xlu0 %1313 }
 0x3a6   :  { %v1453_v27 = vmul.f32 %v1800_v44, %v1302_v2  ;;  %v1454_v28 = vmul.f32 %v1801_v14, %v1302_v2  ;;  %v1459_v0 = vmul.f32 %v1802_v22, %v1314_v15  ;;  %v1460_v46 = vmul.f32 %v1803_v23, %v1314_v15 }
 0x3a8   :  { %1581 = vst [vmem:[#allocation5 + $0x330] sm:$0xff] %v1453_v27  ;;  %1582 = vst [vmem:[#allocation5 + $0x338] sm:$0xff] %v1454_v28 }
 0x3a9   :  { %1587 = vst [vmem:[#allocation5 + $0x360] sm:$0xff] %v1459_v0  ;;  %1588 = vst [vmem:[#allocation5 + $0x368] sm:$0xff] %v1460_v46  ;;  %v1310_v32 = vpop.permute.xlu1 %1309  ;;  %v1322_v45 = vpop.permute.xlu0 %1321 }
 0x3aa   :  { %v1457_v51 = vmul.f32 %v1804_v10, %v1310_v32  ;;  %v1458_v8 = vmul.f32 %v1805_v17, %v1310_v32  ;;  %v1463_v16 = vmul.f32 %v1806_v24, %v1322_v45  ;;  %v1464_v12 = vmul.f32 %v1807_v7, %v1322_v45 }
 0x3ac   :  { %1585 = vst [vmem:[#allocation5 + $0x350] sm:$0xff] %v1457_v51  ;;  %1586 = vst [vmem:[#allocation5 + $0x358] sm:$0xff] %v1458_v8 }
 0x3ad   :  { %1591 = vst [vmem:[#allocation5 + $0x380] sm:$0xff] %v1463_v16  ;;  %1592 = vst [vmem:[#allocation5 + $0x388] sm:$0xff] %v1464_v12  ;;  %v1318_v47 = vpop.permute.xlu1 %1317  ;;  %v1330_v21 = vpop.permute.xlu0 %1329 }
 0x3ae   :  { %v1461_v58 = vmul.f32 %v1808_v26, %v1318_v47  ;;  %v1462_v20 = vmul.f32 %v1809_v33, %v1318_v47  ;;  %v1467_v48 = vmul.f32 %v1810_v18, %v1330_v21  ;;  %v1468_v3 = vmul.f32 %v1811_v25, %v1330_v21 }
 0x3b0   :  { %1589 = vst [vmem:[#allocation5 + $0x370] sm:$0xff] %v1461_v58  ;;  %1590 = vst [vmem:[#allocation5 + $0x378] sm:$0xff] %v1462_v20 }
 0x3b1   :  { %1595 = vst [vmem:[#allocation5 + $0x3a0] sm:$0xff] %v1467_v48  ;;  %1596 = vst [vmem:[#allocation5 + $0x3a8] sm:$0xff] %v1468_v3  ;;  %v1326_v60 = vpop.permute.xlu1 %1325  ;;  %v1338_v34 = vpop.permute.xlu0 %1337 }
 0x3b2   :  { %v1465_v59 = vmul.f32 %v1812_v13, %v1326_v60  ;;  %v1466_v31 = vmul.f32 %v1813_v29, %v1326_v60  ;;  %v1471_v49 = vmul.f32 %v1814_v54, %v1338_v34  ;;  %v1472_v61 = vmul.f32 %v1815_v35, %v1338_v34 }
 0x3b4   :  { %1593 = vst [vmem:[#allocation5 + $0x390] sm:$0xff] %v1465_v59  ;;  %1594 = vst [vmem:[#allocation5 + $0x398] sm:$0xff] %v1466_v31 }
 0x3b5   :  { %1599 = vst [vmem:[#allocation5 + $0x3c0] sm:$0xff] %v1471_v49  ;;  %1600 = vst [vmem:[#allocation5 + $0x3c8] sm:$0xff] %v1472_v61  ;;  %v1334_v6 = vpop.permute.xlu1 %1333  ;;  %v1346_v30 = vpop.permute.xlu0 %1345 }
 0x3b6   :  { %v1469_v37 = vmul.f32 %v1816_v50, %v1334_v6  ;;  %v1470_v38 = vmul.f32 %v1817_v36, %v1334_v6  ;;  %v1475_v39 = vmul.f32 %v1818_v4, %v1346_v30  ;;  %v1476_v40 = vmul.f32 %v1819_v11, %v1346_v30 }
 0x3b8   :  { %1597 = vst [vmem:[#allocation5 + $0x3b0] sm:$0xff] %v1469_v37  ;;  %1598 = vst [vmem:[#allocation5 + $0x3b8] sm:$0xff] %v1470_v38 }
 0x3b9   :  { %1603 = vst [vmem:[#allocation5 + $0x3e0] sm:$0xff] %v1475_v39  ;;  %1604 = vst [vmem:[#allocation5 + $0x3e8] sm:$0xff] %v1476_v40  ;;  %v1342_v41 = vpop.permute.xlu1 %1341 }
 0x3ba   :  { %v1473_v9 = vmul.f32 %v1820_v52, %v1342_v41  ;;  %v1474_v42 = vmul.f32 %v1821_v19, %v1342_v41 }
 0x3bc   :  { %1601 = vst [vmem:[#allocation5 + $0x3d0] sm:$0xff] %v1473_v9  ;;  %1602 = vst [vmem:[#allocation5 + $0x3d8] sm:$0xff] %v1474_v42 }
 0x3bd   :  { %v1350_v43 = vpop.permute.xlu1 %1349 }
 0x3be   :  { %v1477_v5 = vmul.f32 %v1822_v53, %v1350_v43  ;;  %v1478_v57 = vmul.f32 %v1823_v55, %v1350_v43 }
 0x3c0   :  { %1605 = vst [vmem:[#allocation5 + $0x3f0] sm:$0xff] %v1477_v5  ;;  %1606 = vst [vmem:[#allocation5 + $0x3f8] sm:$0xff] %v1478_v57 }
 0x3c1   :  { %1855 = shalt.err (!%p1852_p9)
}
 0x3c2   :  { %1618 = dma.vmem_to_hbm [thread:$0]  %s1613_s3, 16384, %s2357_s5, [#allocation4], %s1869_s21, %s1869_s21, %s1870_s22  }
 0x3c3   :  { %1866 = dma.done.wait [#allocation4], 16384  }
 0x3c4   :  { %1867 = vsyncadd [#allocation4], 4294950912 }
 0x3c5   :  { %1622 = vsyncpa [#allocation3], 1 }
 0x3c6   :  { %1623 = vsyncpa [#allocation4], 1 }

</bundles_post_ra>
